<compile_context>
chip_gen: v7x
topology: tpu7x:2x2x1
jax: 0.10.0
libtpu: 0.0.40
codegen_flags: <defaults>
</compile_context>

<pallas_src>
import jax
import jax.numpy as jnp
from jax.experimental import pallas as pl
from jax.experimental.pallas import tpu as pltpu


def _round_up(x, m):
    return (x + m - 1) // m * m


def rnn_agent_kernel(x_ref, h_ref, w1_ref, wi_ref, wh_ref, w2_ref, bias_ref, out_ref):
    f32 = jnp.float32
    bf16 = jnp.bfloat16
    Hp = h_ref.shape[-1]            # 128-padded hidden width
    A_pad = w2_ref.shape[-1]        # 128-padded action width

    # Bias slab rows: 0 -> b1, 1 -> [bir+bhr | biz+bhz | bin] (gate-aligned),
    #                 2 -> bhn, 3 -> b2. All pad lanes are zero.
    biases = bias_ref[...]
    b1 = biases[0:1, :Hp]
    bi = biases[1:2, :3 * Hp]
    bhn = biases[2:3, :Hp]
    b2 = biases[3:4, :A_pad]

    x = x_ref[...]                  # f32
    h = h_ref[...]                  # f32, pad lanes are exactly zero

    # fc1 + ReLU: bf16 MXU inputs, f32 accumulation. Pad lanes stay exactly 0.
    x1 = jnp.maximum(
        jnp.dot(x.astype(bf16), w1_ref[...], preferred_element_type=f32) + b1,
        0.0)

    # Fused GRU gate matmuls; gate columns 128-aligned: [r | z | n] at 0, Hp, 2Hp.
    gi = jnp.dot(x1.astype(bf16), wi_ref[...], preferred_element_type=f32) + bi
    gh = jnp.dot(h.astype(bf16), wh_ref[...], preferred_element_type=f32)

    # One EUP stream for both sigmoid gates; all slices below are lane-aligned.
    rz = jax.nn.sigmoid(gi[:, :2 * Hp] + gh[:, :2 * Hp])
    r = rz[:, :Hp]
    z = rz[:, Hp:]
    n = jnp.tanh(gi[:, 2 * Hp:] + r * (gh[:, 2 * Hp:] + bhn))
    h_new = (1.0 - z) * n + z * h   # pad lanes remain exactly 0 (elementwise f32)

    # fc2 into the lane-dense padded slab; two 128-aligned stores, no concat.
    out_ref[:, :A_pad] = (
        jnp.dot(h_new.astype(bf16), w2_ref[...], preferred_element_type=f32) + b2)
    out_ref[:, A_pad:] = h_new


def pack_params(params):
    """Pre-pack PyTorch-layout params into the slabs the kernel consumes.

    All matmul weights are stored bf16 with gate columns padded to 128-lane
    offsets; biases stay f32 in one (4, W_b) slab with matching offsets.
    """
    f32, bf16 = jnp.float32, jnp.bfloat16
    I, H = params["w1"].shape
    A = params["w2"].shape[1]
    Hp = _round_up(H, 128)
    A_pad = _round_up(A, 128)

    w1 = jnp.zeros((I, Hp), f32).at[:, :H].set(params["w1"]).astype(bf16)

    def gate_pack(wr, wz, wn):
        w = jnp.zeros((Hp, 3 * Hp), f32)
        w = w.at[:H, 0:H].set(wr)
        w = w.at[:H, Hp:Hp + H].set(wz)
        w = w.at[:H, 2 * Hp:2 * Hp + H].set(wn)
        return w.astype(bf16)

    wi = gate_pack(params["wir"], params["wiz"], params["win"])
    wh = gate_pack(params["whr"], params["whz"], params["whn"])

    w2p = jnp.zeros((Hp, A_pad), f32).at[:H, :A].set(params["w2"]).astype(bf16)

    W_b = max(3 * Hp, A_pad)
    bias = jnp.zeros((4, W_b), f32)
    bias = bias.at[0, :H].set(params["b1"][0])
    bias = bias.at[1, 0:H].set(params["bir"][0] + params["bhr"][0])
    bias = bias.at[1, Hp:Hp + H].set(params["biz"][0] + params["bhz"][0])
    bias = bias.at[1, 2 * Hp:2 * Hp + H].set(params["bin"][0])
    bias = bias.at[2, :H].set(params["bhn"][0])
    bias = bias.at[3, :A].set(params["b2"][0])

    return dict(
        w1=w1, wi=wi, wh=wh, w2p=w2p, bias=bias,
        input_shape=int(I), hidden_dim=int(H), n_actions=int(A),
        a_pad=int(A_pad), h_pad=int(Hp),
    )


def rnn_agent_forward(inputs, hidden_state, packed):
    """inputs: (B, input_shape); hidden_state: broadcastable (*, H). Returns (q, h)."""
    f32 = jnp.float32
    B, I = inputs.shape
    H = packed["hidden_dim"]
    Hp = packed["h_pad"]
    A = packed["n_actions"]
    A_pad = packed["a_pad"]
    OUT_W = A_pad + Hp
    W_b = packed["bias"].shape[1]

    x = inputs.astype(f32)
    h = jnp.broadcast_to(hidden_state.reshape(-1, H).astype(f32), (B, H))

    # Batch-tile selection from a VMEM budget (weights counted double-buffered
    # so the no-single-buffer fallback path also fits).
    weight_bytes = int(sum(int(a.size) * a.dtype.itemsize
                           for a in (packed["w1"], packed["wi"], packed["wh"],
                                     packed["w2p"], packed["bias"])))
    per_row_bytes = 4 * (2 * (I + Hp + OUT_W) + 12 * Hp)   # streamed tiles + temporaries
    budget = 44 << 20
    TB = min(512, _round_up(B, 8))
    while TB > 8 and 2 * weight_bytes + TB * per_row_bytes > budget:
        TB = max(8, _round_up(TB // 2, 8))
    # v7x megacore: the batch grid is what shards across the two TensorCores,
    # so prefer >= 2 grid steps when there is enough batch to split.
    if B >= 256 and _round_up(B, TB) // TB < 2:
        TB = _round_up(pl.cdiv(B, 2), 8)
    B_pad = _round_up(B, TB)
    grid = (B_pad // TB,)

    need = 2 * weight_bytes + TB * per_row_bytes
    vmem_limit = int(min(64 << 20, max(need + need // 4 + (2 << 20), 16 << 20)))

    # Pad batch rows and hidden lanes (zero pads keep GRU pad lanes exactly zero).
    if B_pad != B:
        x = jnp.zeros((B_pad, I), f32).at[:B].set(x)
    if B_pad != B or Hp != H:
        h = jnp.zeros((B_pad, Hp), f32).at[:B, :H].set(h)

    flops = 2 * B_pad * (I * Hp + 2 * Hp * 3 * Hp + Hp * A_pad)
    bytes_accessed = weight_bytes + 4 * B_pad * (I + Hp + OUT_W)
    cost = pl.CostEstimate(flops=flops, transcendentals=3 * B_pad * Hp,
                           bytes_accessed=bytes_accessed)

    def run(single_buffer_weights):
        def wspec(shape):
            idx = lambda i: (0,) * len(shape)
            if single_buffer_weights:
                # Grid-invariant operand: one resident VMEM copy instead of two.
                return pl.BlockSpec(shape, idx, pipeline_mode=pl.Buffered(1))
            return pl.BlockSpec(shape, idx)

        return pl.pallas_call(
            rnn_agent_kernel,
            out_shape=jax.ShapeDtypeStruct((B_pad, OUT_W), f32),
            grid=grid,
            in_specs=[
                pl.BlockSpec((TB, I), lambda i: (i, 0)),      # x
                pl.BlockSpec((TB, Hp), lambda i: (i, 0)),     # h (128-padded)
                wspec((I, Hp)),                               # fc1 weight (bf16)
                wspec((Hp, 3 * Hp)),                          # GRU input weights [r|z|n]
                wspec((Hp, 3 * Hp)),                          # GRU hidden weights [r|z|n]
                wspec((Hp, A_pad)),                           # fc2 weight (bf16)
                wspec((4, W_b)),                              # bias slab (f32)
            ],
            out_specs=pl.BlockSpec((TB, OUT_W), lambda i: (i, 0)),
            compiler_params=pltpu.CompilerParams(
                dimension_semantics=("parallel",),
                vmem_limit_bytes=vmem_limit),
            cost_estimate=cost,
        )(x, h, packed["w1"], packed["wi"], packed["wh"], packed["w2p"], packed["bias"])

    try:
        out = run(True)
    except Exception:
        # This Pallas build rejected pipeline_mode=pl.Buffered(1); fall back to
        # default double-buffering of the grid-invariant weight blocks.
        out = run(False)

    q = out[:B, :A]
    h_new = out[:B, A_pad:A_pad + H]
    return q, h_new


def init_params(key, input_shape, hidden_dim, n_actions):
    """Deterministic synthetic params (PyTorch-style uniform fan-in init),
    stored transposed vs. PyTorch, i.e. (in_features, out_features)."""
    ks = jax.random.split(key, 18)
    ki = iter(ks)

    def unif(k, shape, fan_in):
        bound = 1.0 / jnp.sqrt(jnp.float32(fan_in))
        return jax.random.uniform(k, shape, jnp.float32, -bound, bound)

    p = {}
    p["w1"] = unif(next(ki), (input_shape, hidden_dim), input_shape)
    p["b1"] = unif(next(ki), (1, hidden_dim), input_shape)
    for name in ("wir", "wiz", "win", "whr", "whz", "whn"):
        p[name] = unif(next(ki), (hidden_dim, hidden_dim), hidden_dim)
    for name in ("bir", "biz", "bin", "bhr", "bhz", "bhn"):
        p[name] = unif(next(ki), (1, hidden_dim), hidden_dim)
    p["w2"] = unif(next(ki), (hidden_dim, n_actions), hidden_dim)
    p["b2"] = unif(next(ki), (1, n_actions), hidden_dim)
    return p


def init_hidden(hidden_dim):
    return jnp.zeros((1, hidden_dim), jnp.float32)


def reference_forward(inputs, hidden_state, params):
    """Pure-JAX f32 reference of the PyTorch forward (use_rnn=True path)."""
    hidden_dim = params["w1"].shape[1]
    x = jax.nn.relu(inputs @ params["w1"] + params["b1"])
    h = jnp.broadcast_to(hidden_state.reshape(-1, hidden_dim),
                         (inputs.shape[0], hidden_dim))
    r = jax.nn.sigmoid(x @ params["wir"] + params["bir"] + h @ params["whr"] + params["bhr"])
    z = jax.nn.sigmoid(x @ params["wiz"] + params["biz"] + h @ params["whz"] + params["bhz"])
    n = jnp.tanh(x @ params["win"] + params["bin"] + r * (h @ params["whn"] + params["bhn"]))
    h_new = (1.0 - z) * n + z * h
    q = h_new @ params["w2"] + params["b2"]
    return q, h_new


if __name__ == "__main__":
    # Small shapes consistent with the module: batch of agents, obs dim, hidden, actions.
    B, INPUT_SHAPE, HIDDEN_DIM, N_ACTIONS = 8, 32, 32, 16

    key = jax.random.PRNGKey(0)
    k_param, k_x, k_h = jax.random.split(key, 3)

    params = init_params(k_param, INPUT_SHAPE, HIDDEN_DIM, N_ACTIONS)
    packed = pack_params(params)

    inputs = jax.random.normal(k_x, (B, INPUT_SHAPE), jnp.float32)
    hidden = jax.random.normal(k_h, (B, HIDDEN_DIM), jnp.float32) * 0.1

    q, h = rnn_agent_forward(inputs, hidden, packed)
    q = jax.block_until_ready(q)
    h = jax.block_until_ready(h)

    q_exp, h_exp = reference_forward(inputs, hidden, params)
    assert q.shape == (B, N_ACTIONS) and h.shape == (B, HIDDEN_DIM)
    # bf16 weights with f32 accumulation -> loosened tolerance vs. pure-f32 reference.
    assert jnp.allclose(q, q_exp, atol=2e-2, rtol=2e-2), float(jnp.max(jnp.abs(q - q_exp)))
    assert jnp.allclose(h, h_exp, atol=2e-2, rtol=2e-2), float(jnp.max(jnp.abs(h - h_exp)))

    # Also exercise the (1, H) init_hidden broadcast path.
    q0, h0 = rnn_agent_forward(inputs, init_hidden(HIDDEN_DIM), packed)
    q0 = jax.block_until_ready(q0)
    q0_exp, h0_exp = reference_forward(inputs, jnp.zeros((B, HIDDEN_DIM), jnp.float32), params)
    assert jnp.allclose(q0, q0_exp, atol=2e-2, rtol=2e-2)
    assert jnp.allclose(h0, h0_exp, atol=2e-2, rtol=2e-2)

    print("KERNEL_OK")
</pallas_src>

<mosaic_0001>
module attributes {stable_mosaic.version = 11 : i64} {
  func.func @rnn_agent_kernel(%arg0: i32, %arg1: memref<8x32xf32, #tpu.memory_space<vmem>>, %arg2: memref<8x128xf32, #tpu.memory_space<vmem>>, %arg3: memref<32x128xbf16, #tpu.memory_space<vmem>>, %arg4: memref<128x384xbf16, #tpu.memory_space<vmem>>, %arg5: memref<128x384xbf16, #tpu.memory_space<vmem>>, %arg6: memref<128x128xbf16, #tpu.memory_space<vmem>>, %arg7: memref<4x384xf32, #tpu.memory_space<vmem>>, %arg8: memref<8x256xf32, #tpu.memory_space<vmem>>) attributes {dimension_semantics = [#tpu.dimension_semantics<parallel>], iteration_bounds = array<i64: 1>, scalar_prefetch = 0 : i64, scratch_operands = 0 : i64, tpu.core_type = #tpu.core_type<tc>, window_params = [{transform_indices = @transform_0, window_bounds = array<i64: 8, 32>}, {transform_indices = @transform_1, window_bounds = array<i64: 8, 128>}, {pipeline_mode = #tpu.pipeline_mode<synchronous>, transform_indices = @transform_2, window_bounds = array<i64: 32, 128>}, {pipeline_mode = #tpu.pipeline_mode<synchronous>, transform_indices = @transform_3, window_bounds = array<i64: 128, 384>}, {pipeline_mode = #tpu.pipeline_mode<synchronous>, transform_indices = @transform_4, window_bounds = array<i64: 128, 384>}, {pipeline_mode = #tpu.pipeline_mode<synchronous>, transform_indices = @transform_5, window_bounds = array<i64: 128, 128>}, {pipeline_mode = #tpu.pipeline_mode<synchronous>, transform_indices = @transform_6, window_bounds = array<i64: 4, 384>}, {transform_indices = @transform_7, window_bounds = array<i64: 8, 256>}]} {
    %c0 = arith.constant 0 : index
    %c0_0 = arith.constant 0 : index
    %0 = vector.load %arg7[%c0, %c0_0] : memref<4x384xf32, #tpu.memory_space<vmem>>, vector<4x384xf32>
    %1 = vector.extract_strided_slice %0 {offsets = [0, 0], sizes = [1, 128], strides = [1, 1]} : vector<4x384xf32> to vector<1x128xf32>
    %2 = vector.extract_strided_slice %0 {offsets = [1, 0], sizes = [1, 384], strides = [1, 1]} : vector<4x384xf32> to vector<1x384xf32>
    %3 = vector.extract_strided_slice %0 {offsets = [2, 0], sizes = [1, 128], strides = [1, 1]} : vector<4x384xf32> to vector<1x128xf32>
    %4 = vector.extract_strided_slice %0 {offsets = [3, 0], sizes = [1, 128], strides = [1, 1]} : vector<4x384xf32> to vector<1x128xf32>
    %c0_1 = arith.constant 0 : index
    %c0_2 = arith.constant 0 : index
    %5 = vector.load %arg1[%c0_1, %c0_2] : memref<8x32xf32, #tpu.memory_space<vmem>>, vector<8x32xf32>
    %c0_3 = arith.constant 0 : index
    %c0_4 = arith.constant 0 : index
    %6 = vector.load %arg2[%c0_3, %c0_4] : memref<8x128xf32, #tpu.memory_space<vmem>>, vector<8x128xf32>
    %7 = arith.truncf %5 : vector<8x32xf32> to vector<8x32xbf16>
    %c0_5 = arith.constant 0 : index
    %c0_6 = arith.constant 0 : index
    %8 = vector.load %arg3[%c0_5, %c0_6] : memref<32x128xbf16, #tpu.memory_space<vmem>>, vector<32x128xbf16>
    %cst = arith.constant dense<0.000000e+00> : vector<8x128xf32>
    %9 = tpu.matmul %7, %8, %cst {dimension_numbers = #tpu.dot_dimension_numbers<[1], [0], [0], [1], [0, 0, 1, 1], [], []>} : vector<8x32xbf16>, vector<32x128xbf16>, vector<8x128xf32> -> vector<8x128xf32>
    %10 = vector.broadcast %1 : vector<1x128xf32> to vector<8x128xf32>
    %11 = arith.addf %9, %10 : vector<8x128xf32>
    %cst_7 = arith.constant 0.000000e+00 : f32
    %12 = vector.broadcast %cst_7 : f32 to vector<8x128xf32>
    %13 = arith.maximumf %11, %12 : vector<8x128xf32>
    %14 = arith.truncf %13 : vector<8x128xf32> to vector<8x128xbf16>
    %c0_8 = arith.constant 0 : index
    %c0_9 = arith.constant 0 : index
    %15 = vector.load %arg4[%c0_8, %c0_9] : memref<128x384xbf16, #tpu.memory_space<vmem>>, vector<128x384xbf16>
    %cst_10 = arith.constant dense<0.000000e+00> : vector<8x384xf32>
    %16 = tpu.matmul %14, %15, %cst_10 {dimension_numbers = #tpu.dot_dimension_numbers<[1], [0], [0], [1], [0, 0, 1, 1], [], []>} : vector<8x128xbf16>, vector<128x384xbf16>, vector<8x384xf32> -> vector<8x384xf32>
    %17 = vector.broadcast %2 : vector<1x384xf32> to vector<8x384xf32>
    %18 = arith.addf %16, %17 : vector<8x384xf32>
    %19 = arith.truncf %6 : vector<8x128xf32> to vector<8x128xbf16>
    %c0_11 = arith.constant 0 : index
    %c0_12 = arith.constant 0 : index
    %20 = vector.load %arg5[%c0_11, %c0_12] : memref<128x384xbf16, #tpu.memory_space<vmem>>, vector<128x384xbf16>
    %cst_13 = arith.constant dense<0.000000e+00> : vector<8x384xf32>
    %21 = tpu.matmul %19, %20, %cst_13 {dimension_numbers = #tpu.dot_dimension_numbers<[1], [0], [0], [1], [0, 0, 1, 1], [], []>} : vector<8x128xbf16>, vector<128x384xbf16>, vector<8x384xf32> -> vector<8x384xf32>
    %22 = vector.extract_strided_slice %18 {offsets = [0, 0], sizes = [8, 256], strides = [1, 1]} : vector<8x384xf32> to vector<8x256xf32>
    %23 = vector.extract_strided_slice %21 {offsets = [0, 0], sizes = [8, 256], strides = [1, 1]} : vector<8x384xf32> to vector<8x256xf32>
    %24 = arith.addf %22, %23 : vector<8x256xf32>
    %25 = arith.negf %24 : vector<8x256xf32>
    %26 = math.exp %25 : vector<8x256xf32>
    %cst_14 = arith.constant 1.000000e+00 : f32
    %27 = vector.broadcast %cst_14 : f32 to vector<8x256xf32>
    %28 = arith.addf %27, %26 : vector<8x256xf32>
    %29 = arith.divf %27, %28 : vector<8x256xf32>
    %30 = vector.extract_strided_slice %29 {offsets = [0, 0], sizes = [8, 128], strides = [1, 1]} : vector<8x256xf32> to vector<8x128xf32>
    %31 = vector.extract_strided_slice %29 {offsets = [0, 128], sizes = [8, 128], strides = [1, 1]} : vector<8x256xf32> to vector<8x128xf32>
    %32 = vector.extract_strided_slice %18 {offsets = [0, 256], sizes = [8, 128], strides = [1, 1]} : vector<8x384xf32> to vector<8x128xf32>
    %33 = vector.extract_strided_slice %21 {offsets = [0, 256], sizes = [8, 128], strides = [1, 1]} : vector<8x384xf32> to vector<8x128xf32>
    %34 = vector.broadcast %3 : vector<1x128xf32> to vector<8x128xf32>
    %35 = arith.addf %33, %34 : vector<8x128xf32>
    %36 = arith.mulf %30, %35 : vector<8x128xf32>
    %37 = arith.addf %32, %36 : vector<8x128xf32>
    %38 = math.tanh %37 : vector<8x128xf32>
    %cst_15 = arith.constant 1.000000e+00 : f32
    %39 = vector.broadcast %cst_15 : f32 to vector<8x128xf32>
    %40 = arith.subf %39, %31 : vector<8x128xf32>
    %41 = arith.mulf %40, %38 : vector<8x128xf32>
    %42 = arith.mulf %31, %6 : vector<8x128xf32>
    %43 = arith.addf %41, %42 : vector<8x128xf32>
    %44 = arith.truncf %43 : vector<8x128xf32> to vector<8x128xbf16>
    %c0_16 = arith.constant 0 : index
    %c0_17 = arith.constant 0 : index
    %45 = vector.load %arg6[%c0_16, %c0_17] : memref<128x128xbf16, #tpu.memory_space<vmem>>, vector<128x128xbf16>
    %cst_18 = arith.constant dense<0.000000e+00> : vector<8x128xf32>
    %46 = tpu.matmul %44, %45, %cst_18 {dimension_numbers = #tpu.dot_dimension_numbers<[1], [0], [0], [1], [0, 0, 1, 1], [], []>} : vector<8x128xbf16>, vector<128x128xbf16>, vector<8x128xf32> -> vector<8x128xf32>
    %47 = vector.broadcast %4 : vector<1x128xf32> to vector<8x128xf32>
    %48 = arith.addf %46, %47 : vector<8x128xf32>
    %c0_19 = arith.constant 0 : index
    %c0_20 = arith.constant 0 : index
    %49 = vector.load %arg8[%c0_19, %c0_20] : memref<8x256xf32, #tpu.memory_space<vmem>>, vector<8x128xf32>
    tpu.vector_store %arg8[%c0_19, %c0_20], %48 {strides = array<i32>} : memref<8x256xf32, #tpu.memory_space<vmem>>, vector<8x128xf32>,
    %c0_21 = arith.constant 0 : index
    %c128 = arith.constant 128 : index
    %50 = vector.load %arg8[%c0_21, %c128] : memref<8x256xf32, #tpu.memory_space<vmem>>, vector<8x128xf32>
    tpu.vector_store %arg8[%c0_21, %c128], %43 {strides = array<i32>} : memref<8x256xf32, #tpu.memory_space<vmem>>, vector<8x128xf32>,
    return
  }
  func.func @transform_0(%arg0: i32) -> (i32, i32) {
    %c0_i32 = arith.constant 0 : i32
    %c0_i32_0 = arith.constant 0 : i32
    return %arg0, %c0_i32 : i32, i32
  }
  func.func @transform_1(%arg0: i32) -> (i32, i32) {
    %c0_i32 = arith.constant 0 : i32
    %c0_i32_0 = arith.constant 0 : i32
    return %arg0, %c0_i32 : i32, i32
  }
  func.func @transform_2(%arg0: i32) -> (i32, i32) {
    %c0_i32 = arith.constant 0 : i32
    %c0_i32_0 = arith.constant 0 : i32
    %c0_i32_1 = arith.constant 0 : i32
    return %c0_i32, %c0_i32_0 : i32, i32
  }
  func.func @transform_3(%arg0: i32) -> (i32, i32) {
    %c0_i32 = arith.constant 0 : i32
    %c0_i32_0 = arith.constant 0 : i32
    %c0_i32_1 = arith.constant 0 : i32
    return %c0_i32, %c0_i32_0 : i32, i32
  }
  func.func @transform_4(%arg0: i32) -> (i32, i32) {
    %c0_i32 = arith.constant 0 : i32
    %c0_i32_0 = arith.constant 0 : i32
    %c0_i32_1 = arith.constant 0 : i32
    return %c0_i32, %c0_i32_0 : i32, i32
  }
  func.func @transform_5(%arg0: i32) -> (i32, i32) {
    %c0_i32 = arith.constant 0 : i32
    %c0_i32_0 = arith.constant 0 : i32
    %c0_i32_1 = arith.constant 0 : i32
    return %c0_i32, %c0_i32_0 : i32, i32
  }
  func.func @transform_6(%arg0: i32) -> (i32, i32) {
    %c0_i32 = arith.constant 0 : i32
    %c0_i32_0 = arith.constant 0 : i32
    %c0_i32_1 = arith.constant 0 : i32
    return %c0_i32, %c0_i32_0 : i32, i32
  }
  func.func @transform_7(%arg0: i32) -> (i32, i32) {
    %c0_i32 = arith.constant 0 : i32
    %c0_i32_0 = arith.constant 0 : i32
    return %arg0, %c0_i32 : i32, i32
  }
}

module attributes {stable_mosaic.version = 11 : i64} {
  func.func @rnn_agent_kernel(%arg0: i32, %arg1: memref<8x32xf32, #tpu.memory_space<vmem>>, %arg2: memref<8x128xf32, #tpu.memory_space<vmem>>, %arg3: memref<32x128xbf16, #tpu.memory_space<vmem>>, %arg4: memref<128x384xbf16, #tpu.memory_space<vmem>>, %arg5: memref<128x384xbf16, #tpu.memory_space<vmem>>, %arg6: memref<128x128xbf16, #tpu.memory_space<vmem>>, %arg7: memref<4x384xf32, #tpu.memory_space<vmem>>, %arg8: memref<8x256xf32, #tpu.memory_space<vmem>>) attributes {dimension_semantics = [#tpu.dimension_semantics<parallel>], iteration_bounds = array<i64: 1>, scalar_prefetch = 0 : i64, scratch_operands = 0 : i64, tpu.core_type = #tpu.core_type<tc>, window_params = [{transform_indices = @transform_0, window_bounds = array<i64: 8, 32>}, {transform_indices = @transform_1, window_bounds = array<i64: 8, 128>}, {pipeline_mode = #tpu.pipeline_mode<synchronous>, transform_indices = @transform_2, window_bounds = array<i64: 32, 128>}, {pipeline_mode = #tpu.pipeline_mode<synchronous>, transform_indices = @transform_3, window_bounds = array<i64: 128, 384>}, {pipeline_mode = #tpu.pipeline_mode<synchronous>, transform_indices = @transform_4, window_bounds = array<i64: 128, 384>}, {pipeline_mode = #tpu.pipeline_mode<synchronous>, transform_indices = @transform_5, window_bounds = array<i64: 128, 128>}, {pipeline_mode = #tpu.pipeline_mode<synchronous>, transform_indices = @transform_6, window_bounds = array<i64: 4, 384>}, {transform_indices = @transform_7, window_bounds = array<i64: 8, 256>}]} {
    %c0 = arith.constant 0 : index
    %c0_0 = arith.constant 0 : index
    %0 = vector.load %arg7[%c0, %c0_0] : memref<4x384xf32, #tpu.memory_space<vmem>>, vector<4x384xf32>
    %1 = vector.extract_strided_slice %0 {offsets = [0, 0], sizes = [1, 128], strides = [1, 1]} : vector<4x384xf32> to vector<1x128xf32>
    %2 = vector.extract_strided_slice %0 {offsets = [1, 0], sizes = [1, 384], strides = [1, 1]} : vector<4x384xf32> to vector<1x384xf32>
    %3 = vector.extract_strided_slice %0 {offsets = [2, 0], sizes = [1, 128], strides = [1, 1]} : vector<4x384xf32> to vector<1x128xf32>
    %4 = vector.extract_strided_slice %0 {offsets = [3, 0], sizes = [1, 128], strides = [1, 1]} : vector<4x384xf32> to vector<1x128xf32>
    %c0_1 = arith.constant 0 : index
    %c0_2 = arith.constant 0 : index
    %5 = vector.load %arg1[%c0_1, %c0_2] : memref<8x32xf32, #tpu.memory_space<vmem>>, vector<8x32xf32>
    %c0_3 = arith.constant 0 : index
    %c0_4 = arith.constant 0 : index
    %6 = vector.load %arg2[%c0_3, %c0_4] : memref<8x128xf32, #tpu.memory_space<vmem>>, vector<8x128xf32>
    %7 = arith.truncf %5 : vector<8x32xf32> to vector<8x32xbf16>
    %c0_5 = arith.constant 0 : index
    %c0_6 = arith.constant 0 : index
    %8 = vector.load %arg3[%c0_5, %c0_6] : memref<32x128xbf16, #tpu.memory_space<vmem>>, vector<32x128xbf16>
    %cst = arith.constant dense<0.000000e+00> : vector<8x128xf32>
    %9 = tpu.matmul %7, %8, %cst {dimension_numbers = #tpu.dot_dimension_numbers<[1], [0], [0], [1], [0, 0, 1, 1], [], []>} : vector<8x32xbf16>, vector<32x128xbf16>, vector<8x128xf32> -> vector<8x128xf32>
    %10 = vector.broadcast %1 : vector<1x128xf32> to vector<8x128xf32>
    %11 = arith.addf %9, %10 : vector<8x128xf32>
    %cst_7 = arith.constant 0.000000e+00 : f32
    %12 = vector.broadcast %cst_7 : f32 to vector<8x128xf32>
    %13 = arith.maximumf %11, %12 : vector<8x128xf32>
    %14 = arith.truncf %13 : vector<8x128xf32> to vector<8x128xbf16>
    %c0_8 = arith.constant 0 : index
    %c0_9 = arith.constant 0 : index
    %15 = vector.load %arg4[%c0_8, %c0_9] : memref<128x384xbf16, #tpu.memory_space<vmem>>, vector<128x384xbf16>
    %cst_10 = arith.constant dense<0.000000e+00> : vector<8x384xf32>
    %16 = tpu.matmul %14, %15, %cst_10 {dimension_numbers = #tpu.dot_dimension_numbers<[1], [0], [0], [1], [0, 0, 1, 1], [], []>} : vector<8x128xbf16>, vector<128x384xbf16>, vector<8x384xf32> -> vector<8x384xf32>
    %17 = vector.broadcast %2 : vector<1x384xf32> to vector<8x384xf32>
    %18 = arith.addf %16, %17 : vector<8x384xf32>
    %19 = arith.truncf %6 : vector<8x128xf32> to vector<8x128xbf16>
    %c0_11 = arith.constant 0 : index
    %c0_12 = arith.constant 0 : index
    %20 = vector.load %arg5[%c0_11, %c0_12] : memref<128x384xbf16, #tpu.memory_space<vmem>>, vector<128x384xbf16>
    %cst_13 = arith.constant dense<0.000000e+00> : vector<8x384xf32>
    %21 = tpu.matmul %19, %20, %cst_13 {dimension_numbers = #tpu.dot_dimension_numbers<[1], [0], [0], [1], [0, 0, 1, 1], [], []>} : vector<8x128xbf16>, vector<128x384xbf16>, vector<8x384xf32> -> vector<8x384xf32>
    %22 = vector.extract_strided_slice %18 {offsets = [0, 0], sizes = [8, 256], strides = [1, 1]} : vector<8x384xf32> to vector<8x256xf32>
    %23 = vector.extract_strided_slice %21 {offsets = [0, 0], sizes = [8, 256], strides = [1, 1]} : vector<8x384xf32> to vector<8x256xf32>
    %24 = arith.addf %22, %23 : vector<8x256xf32>
    %25 = arith.negf %24 : vector<8x256xf32>
    %26 = math.exp %25 : vector<8x256xf32>
    %cst_14 = arith.constant 1.000000e+00 : f32
    %27 = vector.broadcast %cst_14 : f32 to vector<8x256xf32>
    %28 = arith.addf %27, %26 : vector<8x256xf32>
    %29 = arith.divf %27, %28 : vector<8x256xf32>
    %30 = vector.extract_strided_slice %29 {offsets = [0, 0], sizes = [8, 128], strides = [1, 1]} : vector<8x256xf32> to vector<8x128xf32>
    %31 = vector.extract_strided_slice %29 {offsets = [0, 128], sizes = [8, 128], strides = [1, 1]} : vector<8x256xf32> to vector<8x128xf32>
    %32 = vector.extract_strided_slice %18 {offsets = [0, 256], sizes = [8, 128], strides = [1, 1]} : vector<8x384xf32> to vector<8x128xf32>
    %33 = vector.extract_strided_slice %21 {offsets = [0, 256], sizes = [8, 128], strides = [1, 1]} : vector<8x384xf32> to vector<8x128xf32>
    %34 = vector.broadcast %3 : vector<1x128xf32> to vector<8x128xf32>
    %35 = arith.addf %33, %34 : vector<8x128xf32>
    %36 = arith.mulf %30, %35 : vector<8x128xf32>
    %37 = arith.addf %32, %36 : vector<8x128xf32>
    %38 = math.tanh %37 : vector<8x128xf32>
    %cst_15 = arith.constant 1.000000e+00 : f32
    %39 = vector.broadcast %cst_15 : f32 to vector<8x128xf32>
    %40 = arith.subf %39, %31 : vector<8x128xf32>
    %41 = arith.mulf %40, %38 : vector<8x128xf32>
    %42 = arith.mulf %31, %6 : vector<8x128xf32>
    %43 = arith.addf %41, %42 : vector<8x128xf32>
    %44 = arith.truncf %43 : vector<8x128xf32> to vector<8x128xbf16>
    %c0_16 = arith.constant 0 : index
    %c0_17 = arith.constant 0 : index
    %45 = vector.load %arg6[%c0_16, %c0_17] : memref<128x128xbf16, #tpu.memory_space<vmem>>, vector<128x128xbf16>
    %cst_18 = arith.constant dense<0.000000e+00> : vector<8x128xf32>
    %46 = tpu.matmul %44, %45, %cst_18 {dimension_numbers = #tpu.dot_dimension_numbers<[1], [0], [0], [1], [0, 0, 1, 1], [], []>} : vector<8x128xbf16>, vector<128x128xbf16>, vector<8x128xf32> -> vector<8x128xf32>
    %47 = vector.broadcast %4 : vector<1x128xf32> to vector<8x128xf32>
    %48 = arith.addf %46, %47 : vector<8x128xf32>
    %c0_19 = arith.constant 0 : index
    %c0_20 = arith.constant 0 : index
    %49 = vector.load %arg8[%c0_19, %c0_20] : memref<8x256xf32, #tpu.memory_space<vmem>>, vector<8x128xf32>
    tpu.vector_store %arg8[%c0_19, %c0_20], %48 {strides = array<i32>} : memref<8x256xf32, #tpu.memory_space<vmem>>, vector<8x128xf32>,
    %c0_21 = arith.constant 0 : index
    %c128 = arith.constant 128 : index
    %50 = vector.load %arg8[%c0_21, %c128] : memref<8x256xf32, #tpu.memory_space<vmem>>, vector<8x128xf32>
    tpu.vector_store %arg8[%c0_21, %c128], %43 {strides = array<i32>} : memref<8x256xf32, #tpu.memory_space<vmem>>, vector<8x128xf32>,
    return
  }
  func.func @transform_0(%arg0: i32) -> (i32, i32) {
    %c0_i32 = arith.constant 0 : i32
    %c0_i32_0 = arith.constant 0 : i32
    return %arg0, %c0_i32 : i32, i32
  }
  func.func @transform_1(%arg0: i32) -> (i32, i32) {
    %c0_i32 = arith.constant 0 : i32
    %c0_i32_0 = arith.constant 0 : i32
    return %arg0, %c0_i32 : i32, i32
  }
  func.func @transform_2(%arg0: i32) -> (i32, i32) {
    %c0_i32 = arith.constant 0 : i32
    %c0_i32_0 = arith.constant 0 : i32
    %c0_i32_1 = arith.constant 0 : i32
    return %c0_i32, %c0_i32_0 : i32, i32
  }
  func.func @transform_3(%arg0: i32) -> (i32, i32) {
    %c0_i32 = arith.constant 0 : i32
    %c0_i32_0 = arith.constant 0 : i32
    %c0_i32_1 = arith.constant 0 : i32
    return %c0_i32, %c0_i32_0 : i32, i32
  }
  func.func @transform_4(%arg0: i32) -> (i32, i32) {
    %c0_i32 = arith.constant 0 : i32
    %c0_i32_0 = arith.constant 0 : i32
    %c0_i32_1 = arith.constant 0 : i32
    return %c0_i32, %c0_i32_0 : i32, i32
  }
  func.func @transform_5(%arg0: i32) -> (i32, i32) {
    %c0_i32 = arith.constant 0 : i32
    %c0_i32_0 = arith.constant 0 : i32
    %c0_i32_1 = arith.constant 0 : i32
    return %c0_i32, %c0_i32_0 : i32, i32
  }
  func.func @transform_6(%arg0: i32) -> (i32, i32) {
    %c0_i32 = arith.constant 0 : i32
    %c0_i32_0 = arith.constant 0 : i32
    %c0_i32_1 = arith.constant 0 : i32
    return %c0_i32, %c0_i32_0 : i32, i32
  }
  func.func @transform_7(%arg0: i32) -> (i32, i32) {
    %c0_i32 = arith.constant 0 : i32
    %c0_i32_0 = arith.constant 0 : i32
    return %arg0, %c0_i32 : i32, i32
  }
}

</mosaic_0001>

<bundles_post_ra>
// kernel: tpu_custom_call.1
= control target key start
LH: loop header
LB: loop body
LE: loop exit
PB: predicated region body
PF: predicated region fallthrough
CT: control target
= control target key end

     0   :  { %12 = vsyncpa [#allocation3], 0  ;;  %s1501_s0 = inlined_call_operand.hbm [shape: f32[8,32], index: 0, kind: input, shape index: {}]   ;;  %s1502_s1 = inlined_call_operand.hbm [shape: f32[8,128], index: 1, kind: input, shape index: {}]   ;;  %s1503_s2 = inlined_call_operand.hbm [shape: bf16[32,128], index: 2, kind: input, shape index: {}]   ;;  %s1504_s3 = inlined_call_operand.hbm [shape: bf16[128,384], index: 3, kind: input, shape index: {}]   ;;  %s1505_s4 = inlined_call_operand.hbm [shape: bf16[128,384], index: 4, kind: input, shape index: {}]   ;;  %s1506_s5 = inlined_call_operand.hbm [shape: bf16[128,128], index: 5, kind: input, shape index: {}]   ;;  %s1507_s6 = inlined_call_operand.vmem [shape: f32[4,384], index: 6, kind: input, shape index: {}]   ;;  %s1508_s7 = inlined_call_operand.hbm [shape: f32[8,256], index: 7, kind: output, shape index: {}]  }
   0x1   :  { %13 = vsyncpa [#allocation6], 0 }
   0x2   :  { %14 = vsyncpa [#allocation9], 0 }
   0x3   :  { %15 = vsyncpa [#allocation12], 0 }
   0x4   :  { %16 = vsyncpa [#allocation4], 0  ;;  %s1271_s24 = smov [#allocation5]   ;;  %s1272_s26 = smov [#allocation8]  }
   0x5   :  { %s33_s25 = sshll.u32 %s1271_s24, 4  ;;  %s54_s27 = sshll.u32 %s1272_s26, 4  ;;  %s34_s25 = int_to_ptr.vmem [resolvable:$true] %s33_s25  ;;  %s1325_s27 = int_to_ptr.vmem [resolvable:$true] %s54_s27 }
   0x6   :  { %s1107_s30 = scalar_lea.hbm %s1502_s1, 128 }
   0x7   :  { %p1108_p0 = scmp.ne.s32.totalorder %s1502_s1, %s1107_s30  ;;  %p1111_p1 = scmp.lt.u32.totalorder %s1107_s30, %s1502_s1 }
   0x9   :  { %p1113_p2 = pnand %p1111_p1, %p1108_p0 }
   0xb   :  { %1116 = shalt.err (!%p1113_p2)
}
   0xc   :  { %s1117_s12 = scalar_lea.vmem %s34_s25, 128  ;;  %p1122_p4 = scmp.lt.s32.totalorder %s34_s25, %s34_s25 }
   0xd   :  { %p1118_p3 = scmp.ne.s32.totalorder %s34_s25, %s1117_s12  ;;  %p1123_p5 = scmp.lt.s32.totalorder %s1117_s12, %s1117_s12 }
   0xf   :  { %p1124_p6 = por %p1123_p5, %p1122_p4 }
  0x11   :  { %p1125_p7 = pnand %p1124_p6, %p1118_p3 }
  0x13   :  { %1128 = shalt.err (!%p1125_p7)
}
  0x14   :  { %36 = dma.hbm_to_vmem [thread:$0]  %s1502_s1, 128, %s34_s25, [#allocation6]  }
  0x15   :  { %s1129_s17 = scalar_lea.hbm %s1504_s3, 3072 }
  0x16   :  { %p1130_p8 = scmp.ne.s32.totalorder %s1504_s3, %s1129_s17  ;;  %p1133_p9 = scmp.lt.u32.totalorder %s1129_s17, %s1504_s3 }
  0x18   :  { %p1135_p10 = pnand %p1133_p9, %p1130_p8 }
  0x1a   :  { %1138 = shalt.err (!%p1135_p10)
}
  0x1b   :  { %s1139_s22 = scalar_lea.vmem %s1325_s27, 3072  ;;  %p1144_p12 = scmp.lt.s32.totalorder %s1325_s27, %s1325_s27 }
  0x1c   :  { %p1140_p11 = scmp.ne.s32.totalorder %s1325_s27, %s1139_s22  ;;  %p1145_p13 = scmp.lt.s32.totalorder %s1139_s22, %s1139_s22 }
  0x1e   :  { %p1146_p0 = por %p1145_p13, %p1144_p12 }
  0x20   :  { %p1147_p1 = pnand %p1146_p0, %p1140_p11 }
  0x22   :  { %1150 = shalt.err (!%p1147_p1)
}
  0x23   :  { %s1273_s1 = smov 192   ;;  %s1274_s23 = smov 12  }
  0x24   :  { %60 = dma.hbm_to_vmem [thread:$0]  %s1504_s3, 3072, %s1325_s27, [#allocation9], %s1273_s1, %s1273_s1, %s1274_s23  }
  0x25   :  { %s1275_s26 = smov [#allocation2]   ;;  %s1276_s29 = smov [#allocation7]  }
  0x26   :  { %s23_s28 = sshll.u32 %s1275_s26, 4  ;;  %s42_s30 = sshll.u32 %s1276_s29, 4  ;;  %s24_s28 = int_to_ptr.vmem [resolvable:$true] %s23_s28  ;;  %s1359_s30 = int_to_ptr.vmem [resolvable:$true] %s42_s30 }
  0x27   :  { %s1151_s10 = scalar_lea.hbm %s1501_s0, 128 }
  0x28   :  { %p1152_p2 = scmp.ne.s32.totalorder %s1501_s0, %s1151_s10  ;;  %p1155_p3 = scmp.lt.u32.totalorder %s1151_s10, %s1501_s0 }
  0x2a   :  { %p1157_p4 = pnand %p1155_p3, %p1152_p2 }
  0x2c   :  { %1160 = shalt.err (!%p1157_p4)
}
  0x2d   :  { %s1161_s3 = scalar_lea.vmem %s24_s28, 128  ;;  %p1166_p6 = scmp.lt.s32.totalorder %s24_s28, %s24_s28 }
  0x2e   :  { %p1162_p5 = scmp.ne.s32.totalorder %s24_s28, %s1161_s3  ;;  %p1167_p7 = scmp.lt.s32.totalorder %s1161_s3, %s1161_s3 }
  0x30   :  { %p1168_p8 = por %p1167_p7, %p1166_p6 }
  0x32   :  { %p1169_p9 = pnand %p1168_p8, %p1162_p5 }
  0x34   :  { %1172 = shalt.err (!%p1169_p9)
}
  0x35   :  { %26 = dma.hbm_to_vmem [thread:$0]  %s1501_s0, 128, %s24_s28, [#allocation3]  }
  0x36   :  { %s1173_s18 = scalar_lea.hbm %s1503_s2, 256 }
  0x37   :  { %p1174_p10 = scmp.ne.s32.totalorder %s1503_s2, %s1173_s18  ;;  %p1177_p11 = scmp.lt.u32.totalorder %s1173_s18, %s1503_s2 }
  0x39   :  { %p1179_p12 = pnand %p1177_p11, %p1174_p10 }
  0x3b   :  { %1182 = shalt.err (!%p1179_p12)
}
  0x3c   :  { %s1183_s24 = scalar_lea.vmem %s1359_s30, 256  ;;  %p1188_p0 = scmp.lt.s32.totalorder %s1359_s30, %s1359_s30 }
  0x3d   :  { %p1184_p13 = scmp.ne.s32.totalorder %s1359_s30, %s1183_s24  ;;  %p1189_p1 = scmp.lt.s32.totalorder %s1183_s24, %s1183_s24 }
  0x3f   :  { %p1190_p2 = por %p1189_p1, %p1188_p0 }
  0x41   :  { %p1191_p3 = pnand %p1190_p2, %p1184_p13 }
  0x43   :  { %1194 = shalt.err (!%p1191_p3)
}
  0x44   :  { %s1277_s0 = smov 64   ;;  %s1278_s25 = smov 4  }
  0x45   :  { %48 = dma.hbm_to_vmem [thread:$0]  %s1503_s2, 256, %s1359_s30, [#allocation6], %s1277_s0, %s1277_s0, %s1278_s25  }
  0x46   :  { %s1279_s29 = smov [#allocation10]   ;;  %s1280_s9 = smov [#allocation11]  }
  0x47   :  { %s66_s8 = sshll.u32 %s1279_s29, 4  ;;  %s78_s10 = sshll.u32 %s1280_s9, 4  ;;  %s67_s8 = int_to_ptr.vmem [resolvable:$true] %s66_s8  ;;  %s1393_s10 = int_to_ptr.vmem [resolvable:$true] %s78_s10 }
  0x48   :  { %s1195_s13 = scalar_lea.hbm %s1505_s4, 3072 }
  0x49   :  { %p1196_p4 = scmp.ne.s32.totalorder %s1505_s4, %s1195_s13  ;;  %p1199_p5 = scmp.lt.u32.totalorder %s1195_s13, %s1505_s4 }
  0x4b   :  { %p1201_p6 = pnand %p1199_p5, %p1196_p4 }
  0x4d   :  { %1204 = shalt.err (!%p1201_p6)
}
  0x4e   :  { %s1205_s2 = scalar_lea.vmem %s67_s8, 3072  ;;  %p1210_p8 = scmp.lt.s32.totalorder %s67_s8, %s67_s8 }
  0x4f   :  { %p1206_p7 = scmp.ne.s32.totalorder %s67_s8, %s1205_s2  ;;  %p1211_p9 = scmp.lt.s32.totalorder %s1205_s2, %s1205_s2 }
  0x51   :  { %p1212_p10 = por %p1211_p9, %p1210_p8 }
  0x53   :  { %p1213_p11 = pnand %p1212_p10, %p1206_p7 }
  0x55   :  { %1216 = shalt.err (!%p1213_p11)
}
  0x56   :  { %72 = dma.hbm_to_vmem [thread:$0]  %s1505_s4, 3072, %s67_s8, [#allocation9], %s1273_s1, %s1273_s1, %s1274_s23  }
  0x57   :  { %s1217_s19 = scalar_lea.hbm %s1506_s5, 1024 }
  0x58   :  { %p1218_p12 = scmp.ne.s32.totalorder %s1506_s5, %s1217_s19  ;;  %p1221_p13 = scmp.lt.u32.totalorder %s1217_s19, %s1506_s5 }
  0x5a   :  { %p1223_p0 = pnand %p1221_p13, %p1218_p12 }
  0x5c   :  { %1226 = shalt.err (!%p1223_p0)
}
  0x5d   :  { %s1227_s26 = scalar_lea.vmem %s1393_s10, 1024  ;;  %p1232_p2 = scmp.lt.s32.totalorder %s1393_s10, %s1393_s10 }
  0x5e   :  { %p1228_p1 = scmp.ne.s32.totalorder %s1393_s10, %s1227_s26  ;;  %p1233_p3 = scmp.lt.s32.totalorder %s1227_s26, %s1227_s26 }
  0x60   :  { %p1234_p4 = por %p1233_p3, %p1232_p2 }
  0x62   :  { %p1235_p5 = pnand %p1234_p4, %p1228_p1 }
  0x64   :  { %1238 = shalt.err (!%p1235_p5)
}
  0x65   :  { %84 = dma.hbm_to_vmem [thread:$0]  %s1506_s5, 1024, %s1393_s10, [#allocation12], %s1277_s0, %s1277_s0, %s1278_s25  }
  0x66   :  { %1261 = dma.done.wait [#allocation3], 128  }
  0x67   :  { %1262 = vsyncadd [#allocation3], 4294967168 }
  0x68   :  { %1263 = dma.done.wait [#allocation6], 384  }
  0x69   :  { %1264 = vsyncadd [#allocation6], 4294966912 }
  0x6a   :  { %1265 = dma.done.wait [#allocation9], 6144  }
  0x6b   :  { %1266 = vsyncadd [#allocation9], 4294961152 }
  0x6c   :  { %1267 = dma.done.wait [#allocation12], 1024  }
  0x6d   :  { %1268 = vsyncadd [#allocation12], 4294966272  ;;  %v1281_v0 = vmov 0.0   ;;  %vm1282_vm0 = vmmov 0   ;;  %v1023_v1 = vld [vmem:[#allocation7] sm:$0xff]   ;;  %v1024_v2 = vld [vmem:[#allocation7 + $0x8] sm:$0xff]   ;;  %v115_v31 = vlaneseq }
  0x6e   :  { %935 = vmatprep.subr.bf16.mxu0 %v1281_v0  ;;  %939 = vmatprep.mubr.msk.bf16.mxu0 %vm1282_vm0, %v1281_v0  ;;  %v108_v3 = vld [vmem:[#allocation2] sm:$0xff]  ;;  %vm131_vm1 = vcmask 261120   ;;  %v1028_v7 = vld [vmem:[#allocation8 + $0x8] ss:$12 sps:$4 sm:$0xff]   ;;  %v1035_v12 = vld [vmem:[#allocation8 + $0x30] ss:$12 sps:$4 sm:$0xff]  }
  0x6f   :  { %936 = vmatpush3.bf16.msra.mxu0 %v1023_v1  ;;  %v1025_v4 = vld [vmem:[#allocation8 + $0x4] ss:$12 sps:$4 sm:$0xff]   ;;  %v1027_v5 = vld [vmem:[#allocation8] ss:$12 sps:$4 sm:$0xff]   ;;  %v110_v6 = vpack.c.bf16 %v108_v3, %v108_v3  ;;  %v1029_v8 = vld [vmem:[#allocation8 + $0x1c] ss:$12 sps:$4 sm:$0xff]  }
  0x70   :  { %937 = vmatprep.subr.bf16.mxu0 %v1281_v0  ;;  %366 = vmatprep.subr.bf16.mxu1 %v1025_v4  ;;  %v1031_v9 = vld [vmem:[#allocation8 + $0x18] ss:$12 sps:$4 sm:$0xff]   ;;  %v1033_v10 = vld [vmem:[#allocation8 + $0x34] ss:$12 sps:$4 sm:$0xff]   ;;  %v1040_v17 = vld [vmem:[#allocation8 + $0x50] ss:$12 sps:$4 sm:$0xff]  }
  0x71   :  { %367 = vmatpush1.bf16.msra.mxu1 %v1027_v5  ;;  %v1032_v11 = vld [vmem:[#allocation8 + $0x20] ss:$12 sps:$4 sm:$0xff]   ;;  %v1036_v14 = vld [vmem:[#allocation8 + $0x38] ss:$12 sps:$4 sm:$0xff]   ;;  %v1039_v15 = vld [vmem:[#allocation8 + $0x48] ss:$12 sps:$4 sm:$0xff]  }
  0x72   :  { %368 = vmatprep.subr.bf16.mxu1 %v1029_v8  ;;  %v1037_v13 = vld [vmem:[#allocation8 + $0x4c] ss:$12 sps:$4 sm:$0xff]   ;;  %v1041_v16 = vld [vmem:[#allocation8 + $0x64] ss:$12 sps:$4 sm:$0xff]   ;;  %v1045_v19 = vld [vmem:[#allocation8 + $0x7c] ss:$12 sps:$4 sm:$0xff]  }
  0x73   :  { %938 = vmatpush3.bf16.msra.mxu0 %v1024_v2  ;;  %v1043_v18 = vld [vmem:[#allocation8 + $0x60] ss:$12 sps:$4 sm:$0xff]   ;;  %v1044_v20 = vld [vmem:[#allocation8 + $0x68] ss:$12 sps:$4 sm:$0xff]   ;;  %v1047_v21 = vld [vmem:[#allocation8 + $0x78] ss:$12 sps:$4 sm:$0xff]  }
  0x74   :  { %943 = vmatprep.subr.bf16.mxu0 %v1281_v0  ;;  %v1049_v22 = vld [vmem:[#allocation8 + $0x94] ss:$12 sps:$4 sm:$0xff]   ;;  %v1051_v24 = vld [vmem:[#allocation8 + $0x90] ss:$12 sps:$4 sm:$0xff]   ;;  %v1052_v25 = vld [vmem:[#allocation8 + $0x98] ss:$12 sps:$4 sm:$0xff]  }
  0x75   :  { %369 = vmatpush1.bf16.msra.mxu1 %v1031_v9  ;;  %v1048_v23 = vld [vmem:[#allocation8 + $0x80] ss:$12 sps:$4 sm:$0xff]   ;;  %v1055_v27 = vld [vmem:[#allocation8 + $0xa8] ss:$12 sps:$4 sm:$0xff]   ;;  %v1056_v28 = vld [vmem:[#allocation8 + $0xb0] ss:$12 sps:$4 sm:$0xff]  }
  0x76   :  { %940 = vmatmul.mubr.msk.bf16.vlgmr.msra.gmra.mrb[0].mxu0 %vm131_vm1, %v110_v6  ;;  %370 = vmatprep.subr.bf16.mxu1 %v1033_v10  ;;  %v1053_v26 = vld [vmem:[#allocation8 + $0xac] ss:$12 sps:$4 sm:$0xff]   ;;  %v1059_v29 = vld [vmem:[#allocation10 + $0x4] ss:$12 sps:$4 sm:$0xff]   ;;  %v1283_v30 = vmov 0   ;;  %v1445_v32 = vshrl.u32 %v115_v31, 7 }
  0x77   :  { %944 = vmatpush3.bf16.msra.mxu0 %v1028_v7  ;;  %959 = vmatprep.mubr.msk.bf16.mxu0 %vm1282_vm0, %v1281_v0  ;;  %v1451_v34 = vld [vmem:[%s1507_s6] sm:$0xff]  ;;  %v1057_v42 = vld [vmem:[#allocation10] ss:$12 sps:$4 sm:$0xff]   ;;  %v1062_v45 = vld [vmem:[#allocation10 + $0x1c] ss:$12 sps:$4 sm:$0xff]  }
  0x78   :  { %945 = vmatprep.subr.bf16.mxu0 %v1281_v0  ;;  %398 = vmatprep.mubr.bf16.mxu1 %v1283_v30  ;;  %v117_v33 = vsub.s32 0, %v1445_v32  ;;  %v1078_v43 = vld [vmem:[#allocation10 + $0x8] ss:$12 sps:$4 sm:$0xff]   ;;  %v1060_v46 = vld [vmem:[#allocation10 + $0x18] ss:$12 sps:$4 sm:$0xff]  }
  0x79   :  { %371 = vmatpush1.bf16.msra.mxu1 %v1035_v12  ;;  %v1082_v47 = vld [vmem:[#allocation10 + $0x20] ss:$12 sps:$4 sm:$0xff]   ;;  %v1063_v49 = vld [vmem:[#allocation10 + $0x30] ss:$12 sps:$4 sm:$0xff]   ;;  %v1083_v50 = vld [vmem:[#allocation10 + $0x38] ss:$12 sps:$4 sm:$0xff]  }
  0x7a   :  { %372 = vmatprep.subr.bf16.mxu1 %v1037_v13  ;;  %v118_v35 = vrot.slane %v1451_v34, %v117_v33  ;;  %v1065_v48 = vld [vmem:[#allocation10 + $0x34] ss:$12 sps:$4 sm:$0xff]   ;;  %v1068_v51 = vld [vmem:[#allocation10 + $0x4c] ss:$12 sps:$4 sm:$0xff]   ;;  %v1084_v53 = vld [vmem:[#allocation10 + $0x50] ss:$12 sps:$4 sm:$0xff]  }
  0x7b   :  { %946 = vmatpush3.bf16.msra.mxu0 %v1032_v11  ;;  %v1066_v52 = vld [vmem:[#allocation10 + $0x48] ss:$12 sps:$4 sm:$0xff]   ;;  %v1071_v54 = vld [vmem:[#allocation10 + $0x64] ss:$12 sps:$4 sm:$0xff]   ;;  %v1069_v55 = vld [vmem:[#allocation10 + $0x60] ss:$12 sps:$4 sm:$0xff]  }
  0x7c   :  { %947 = vmatprep.subr.bf16.mxu0 %v1281_v0  ;;  %v1085_v56 = vld [vmem:[#allocation10 + $0x68] ss:$12 sps:$4 sm:$0xff]   ;;  %v1072_v58 = vld [vmem:[#allocation10 + $0x78] ss:$12 sps:$4 sm:$0xff]   ;;  %v1086_v59 = vld [vmem:[#allocation10 + $0x80] ss:$12 sps:$4 sm:$0xff]  }
  0x7d   :  { %373 = vmatpush1.bf16.msra.mxu1 %v1039_v15  ;;  %v1074_v57 = vld [vmem:[#allocation10 + $0x7c] ss:$12 sps:$4 sm:$0xff]   ;;  %v1077_v60 = vld [vmem:[#allocation10 + $0x94] ss:$12 sps:$4 sm:$0xff]   ;;  %v1087_v62 = vld [vmem:[#allocation10 + $0x98] ss:$12 sps:$4 sm:$0xff]  }
  0x7e   :  { %374 = vmatprep.subr.bf16.mxu1 %v1041_v16  ;;  %v1075_v61 = vld [vmem:[#allocation10 + $0x90] ss:$12 sps:$4 sm:$0xff]   ;;  %v1081_v63 = vld [vmem:[#allocation10 + $0xac] ss:$12 sps:$4 sm:$0xff]   ;;  %v1079_v1 = vld [vmem:[#allocation10 + $0xa8] ss:$12 sps:$4 sm:$0xff]  }
  0x7f   :  { %948 = vmatpush3.bf16.msra.mxu0 %v1036_v14  ;;  %v1462_v2 = vld [vmem:[#allocation5] sm:$0xff]  ;;  %v1088_v3 = vld [vmem:[#allocation10 + $0xb0] ss:$12 sps:$4 sm:$0xff]   ;;  %v1089_v5 = vld [vmem:[#allocation11] sm:$0xff]  }
  0x80   :  { %949 = vmatprep.subr.bf16.mxu0 %v1281_v0  ;;  %v447_v4 = vpack.c.bf16 %v1462_v2, %v1462_v2  ;;  %v1090_v6 = vld [vmem:[#allocation11 + $0x8] sm:$0xff]   ;;  %v1091_v7 = vld [vmem:[#allocation11 + $0x10] sm:$0xff]   ;;  %v1092_v8 = vld [vmem:[#allocation11 + $0x18] sm:$0xff]  }
  0x81   :  { %375 = vmatpush1.bf16.msra.mxu1 %v1043_v18  ;;  %v1093_v9 = vld [vmem:[#allocation11 + $0x20] sm:$0xff]   ;;  %v1094_v10 = vld [vmem:[#allocation11 + $0x28] sm:$0xff]   ;;  %v1095_v11 = vld [vmem:[#allocation11 + $0x30] sm:$0xff]   ;;  %v217_v18 = vsub.s32 5, %v1445_v32 }
  0x82   :  { %376 = vmatprep.subr.bf16.mxu1 %v1045_v19  ;;  %v1096_v12 = vld [vmem:[#allocation11 + $0x38] sm:$0xff]  }
  0x83   :  { %950 = vmatpush3.bf16.msra.mxu0 %v1040_v17  ;;  %v213_v17 = vsub.s32 1, %v1445_v32 }
  0x84   :  { %951 = vmatprep.subr.bf16.mxu0 %v1281_v0 }
  0x85   :  { %377 = vmatpush1.bf16.msra.mxu1 %v1047_v21  ;;  %v214_v19 = vrot.slane %v1451_v34, %v213_v17 }
  0x86   :  { %378 = vmatprep.subr.bf16.mxu1 %v1049_v22 }
  0x87   :  { %952 = vmatpush3.bf16.msra.mxu0 %v1044_v20  ;;  %v218_v20 = vrot.slane %v1451_v34, %v217_v18  ;;  %v229_v21 = vrot.slane %v214_v19, %v213_v17 }
  0x88   :  { %953 = vmatprep.subr.bf16.mxu0 %v1281_v0 }
  0x89   :  { %379 = vmatpush1.bf16.msra.mxu1 %v1051_v24 }
  0x8a   :  { %380 = vmatprep.subr.bf16.mxu1 %v1053_v26 }
  0x8b   :  { %954 = vmatpush3.bf16.msra.mxu0 %v1048_v23  ;;  %v233_v23 = vrot.slane %v218_v20, %v213_v17 }
  0x8c   :  { %955 = vmatprep.subr.bf16.mxu0 %v1281_v0 }
  0x8d   :  { %381 = vmatpush1.bf16.msra.mxu1 %v1055_v27 }
  0x8e   :  { %608 = vmatprep.subr.bf16.mxu1 %v1059_v29 }
  0x8f   :  { %956 = vmatpush3.bf16.msra.mxu0 %v1052_v25 }
  0x90   :  { %957 = vmatprep.subr.bf16.mxu0 %v1281_v0 }
  0x93   :  { %958 = vmatpush3.bf16.msra.mxu0 %v1056_v28 }
  0x94   :  { %963 = vmatprep.subr.bf16.mxu0 %v1281_v0 }
 0x149   :  { %v169_v36 = vpop.f32.mrb[0].mxu0 }
 0x14a   :  { %v170_v37 = vadd.f32 %v169_v36, %v118_v35  ;;  %v941_v38 = vpop.f32.mrb[1].mxu0 }
 0x14b   :  { %v172_v39 = vpop.f32.mrb[2].mxu0  ;;  %v705_v38 = vsub.s32 2, %v1445_v32 }
 0x14c   :  { %v175_v40 = vmax.f32 %v170_v37, 0.0  ;;  %v942_v41 = vpop.f32.mrb[3].mxu0  ;;  %v107_v39 = vld [vmem:[%s1507_s6 + $0x8] sm:$0xf]  ;;  %s1284_s6 = smov [#allocation13]  }
 0x14d   :  { %v706_v41 = vrot.slane %v1451_v34, %v705_v38  ;;  %s832_s28 = sshll.u32 %s1284_s6, 4  ;;  %s833_s28 = int_to_ptr.vmem [resolvable:$true] %s832_s28 }
 0x14e   :  { %v176_v44 = vpack.c.bf16 %v175_v40, %v175_v40  ;;  %v222_v40 = vrot.slane %v107_v39, %v213_v17  ;;  %s1239_s29 = scalar_lea.vmem %s833_s28, 256  ;;  %p1244_p7 = scmp.lt.s32.totalorder %s833_s28, %s833_s28 }
 0x14f   :  { %p1240_p6 = scmp.ne.s32.totalorder %s833_s28, %s1239_s29  ;;  %p1245_p8 = scmp.lt.s32.totalorder %s1239_s29, %s1239_s29 }
 0x150   :  { %399 = vmatmul.mubr.bf16.vlgmr.msra.gmra.mrb[0].mxu1 %v176_v44  ;;  %960 = vmatmul.mubr.bf16.vlgmr.msra.gmra.mrb[4].mxu0 %v176_v44 }
 0x151   :  { %609 = vmatpush1.bf16.msra.mxu1 %v1057_v42  ;;  %964 = vmatpush3.bf16.msra.mxu0 %v1078_v43  ;;  %v237_v43 = vrot.slane %v222_v40, %v213_v17  ;;  %p1246_p9 = por %p1245_p8, %p1244_p7 }
 0x152   :  { %610 = vmatprep.subr.bf16.mxu1 %v1062_v45  ;;  %965 = vmatprep.subr.bf16.mxu0 %v1281_v0 }
 0x153   :  { %640 = vmatprep.mubr.bf16.mxu1 %v1283_v30  ;;  %979 = vmatprep.mubr.msk.bf16.mxu0 %vm1282_vm0, %v1281_v0  ;;  %p1247_p10 = pnand %p1246_p9, %p1240_p6 }
 0x155   :  { %611 = vmatpush1.bf16.msra.mxu1 %v1060_v46  ;;  %966 = vmatpush3.bf16.msra.mxu0 %v1082_v47 }
 0x156   :  { %612 = vmatprep.subr.bf16.mxu1 %v1065_v48  ;;  %967 = vmatprep.subr.bf16.mxu0 %v1281_v0 }
 0x159   :  { %613 = vmatpush1.bf16.msra.mxu1 %v1063_v49  ;;  %968 = vmatpush3.bf16.msra.mxu0 %v1083_v50 }
 0x15a   :  { %614 = vmatprep.subr.bf16.mxu1 %v1068_v51  ;;  %969 = vmatprep.subr.bf16.mxu0 %v1281_v0 }
 0x15d   :  { %615 = vmatpush1.bf16.msra.mxu1 %v1066_v52  ;;  %970 = vmatpush3.bf16.msra.mxu0 %v1084_v53 }
 0x15e   :  { %616 = vmatprep.subr.bf16.mxu1 %v1071_v54  ;;  %971 = vmatprep.subr.bf16.mxu0 %v1281_v0 }
 0x161   :  { %617 = vmatpush1.bf16.msra.mxu1 %v1069_v55  ;;  %972 = vmatpush3.bf16.msra.mxu0 %v1085_v56 }
 0x162   :  { %618 = vmatprep.subr.bf16.mxu1 %v1074_v57  ;;  %973 = vmatprep.subr.bf16.mxu0 %v1281_v0  ;;  %v734_v57 = vsub.s32 3, %v1445_v32 }
 0x165   :  { %619 = vmatpush1.bf16.msra.mxu1 %v1072_v58  ;;  %974 = vmatpush3.bf16.msra.mxu0 %v1086_v59  ;;  %v735_v58 = vrot.slane %v1451_v34, %v734_v57 }
 0x166   :  { %620 = vmatprep.subr.bf16.mxu1 %v1077_v60  ;;  %975 = vmatprep.subr.bf16.mxu0 %v1281_v0 }
 0x169   :  { %621 = vmatpush1.bf16.msra.mxu1 %v1075_v61  ;;  %976 = vmatpush3.bf16.msra.mxu0 %v1087_v62 }
 0x16a   :  { %622 = vmatprep.subr.bf16.mxu1 %v1081_v63  ;;  %977 = vmatprep.subr.bf16.mxu0 %v1281_v0 }
 0x16d   :  { %623 = vmatpush1.bf16.msra.mxu1 %v1079_v1  ;;  %978 = vmatpush3.bf16.msra.mxu0 %v1088_v3 }
 0x16e   :  { %983 = vmatprep.subr.bf16.mxu1 %v1281_v0 }
 0x170   :  { %641 = vmatmul.mubr.bf16.vlgmr.msra.gmra.mrb[0].mxu1 %v447_v4  ;;  %980 = vmatmul.mubr.bf16.vlgmr.msra.gmra.mrb[8].mxu0 %v447_v4 }
 0x171   :  { %999 = vmatprep.mubr.msk.bf16.mxu1 %vm1282_vm0, %v1281_v0  ;;  %984 = vmatpush3.bf16.msra.mxu1 %v1089_v5 }
 0x172   :  { %985 = vmatprep.subr.bf16.mxu1 %v1281_v0 }
 0x175   :  { %986 = vmatpush3.bf16.msra.mxu1 %v1090_v6 }
 0x176   :  { %987 = vmatprep.subr.bf16.mxu1 %v1281_v0 }
 0x179   :  { %988 = vmatpush3.bf16.msra.mxu1 %v1091_v7 }
 0x17a   :  { %989 = vmatprep.subr.bf16.mxu1 %v1281_v0 }
 0x17d   :  { %990 = vmatpush3.bf16.msra.mxu1 %v1092_v8 }
 0x17e   :  { %991 = vmatprep.subr.bf16.mxu1 %v1281_v0 }
 0x181   :  { %992 = vmatpush3.bf16.msra.mxu1 %v1093_v9 }
 0x182   :  { %993 = vmatprep.subr.bf16.mxu1 %v1281_v0 }
 0x185   :  { %994 = vmatpush3.bf16.msra.mxu1 %v1094_v10 }
 0x186   :  { %995 = vmatprep.subr.bf16.mxu1 %v1281_v0 }
 0x189   :  { %996 = vmatpush3.bf16.msra.mxu1 %v1095_v11 }
 0x18a   :  { %997 = vmatprep.subr.bf16.mxu1 %v1281_v0 }
 0x18d   :  { %998 = vmatpush3.bf16.msra.mxu1 %v1096_v12 }
 0x223   :  { %v441_v13 = vpop.f32.mrb[4].mxu0 }
 0x224   :  { %v961_v14 = vpop.f32.mrb[5].mxu0  ;;  %v442_v47 = vadd.f32 %v441_v13, %v237_v43 }
 0x225   :  { %v444_v15 = vpop.f32.mrb[6].mxu0 }
 0x226   :  { %v962_v16 = vpop.f32.mrb[7].mxu0 }
 0x243   :  { %v642_v22 = vpop.f32.mrb[0].mxu1  ;;  %v683_v24 = vpop.f32.mrb[8].mxu0 }
 0x244   :  { %v1003_v25 = vadd.f32 %v642_v22, %v229_v21  ;;  %v644_v26 = vpop.f32.mrb[1].mxu1  ;;  %v981_v0 = vpop.f32.mrb[9].mxu0  ;;  %v707_v45 = vadd.f32 %v706_v41, %v683_v24 }
 0x245   :  { %v646_v27 = vpop.f32.mrb[2].mxu1  ;;  %v686_v28 = vpop.f32.mrb[10].mxu0  ;;  %v1004_v33 = vadd.f32 %v644_v26, %v233_v23 }
 0x246   :  { %v895_v29 = vmul.f32 -1.442695, %v1003_v25  ;;  %v647_v30 = vpop.f32.mrb[3].mxu1  ;;  %v982_v31 = vpop.f32.mrb[11].mxu0 }
 0x247   :  { %v896_v35 = vmul.f32 -1.442695, %v1004_v33 }
 0x248   :  { %1097 = vpow2.f32 %v895_v29 }
 0x249   :  { %1099 = vpow2.f32 %v896_v35 }
 0x252   :  { %v1098_v36 = vpop.eup %1097 }
 0x253   :  { %v697_v37 = vadd.f32 1.0, %v1098_v36  ;;  %v1100_v42 = vpop.eup %1099 }
 0x254   :  { %v698_v44 = vadd.f32 1.0, %v1100_v42 }
 0x255   :  { %1101 = vrcp.f32 %v697_v37 }
 0x256   :  { %1103 = vrcp.f32 %v698_v44 }
 0x25f   :  { %v1102_v46 = vpop.eup %1101 }
 0x260   :  { %v708_v48 = vmul.f32 %v1102_v46, %v707_v45  ;;  %v1104_v50 = vpop.eup %1103 }
 0x261   :  { %v711_v51 = vsub.f32 1.0, %v1104_v50  ;;  %v713_v54 = vmul.f32 %v1104_v50, %v1462_v2 }
 0x262   :  { %v709_v49 = vadd.f32 %v708_v48, %v442_v47 }
 0x264   :  { %1105 = vtanh.f32 %v709_v49 }
 0x26e   :  { %v1106_v52 = vpop.eup %1105 }
 0x26f   :  { %v712_v53 = vmul.f32 %v1106_v52, %v711_v51 }
 0x271   :  { %v714_v55 = vadd.f32 %v713_v54, %v712_v53 }
 0x273   :  { %v715_v56 = vpack.c.bf16 %v714_v55, %v714_v55  ;;  %825 = vst [vmem:[#allocation13 + $0x8] sm:$0xff] %v714_v55 }
 0x275   :  { %1000 = vmatmul.mubr.bf16.vlgmr.msra.gmra.mrb[4].mxu1 %v715_v56 }
 0x348   :  { %v818_v59 = vpop.f32.mrb[4].mxu1 }
 0x349   :  { %v819_v60 = vadd.f32 %v818_v59, %v735_v58  ;;  %v1001_v61 = vpop.f32.mrb[5].mxu1 }
 0x34a   :  { %v821_v62 = vpop.f32.mrb[6].mxu1 }
 0x34b   :  { %824 = vst [vmem:[#allocation13] sm:$0xff] %v819_v60  ;;  %v1002_v63 = vpop.f32.mrb[7].mxu1 }
 0x34c   :  { %1250 = shalt.err (!%p1247_p10)
}
 0x34d   :  { %s1251_s10 = scalar_lea.hbm %s1508_s7, 256 }
 0x34e   :  { %p1252_p11 = scmp.ne.s32.totalorder %s1508_s7, %s1251_s10  ;;  %p1255_p12 = scmp.lt.u32.totalorder %s1251_s10, %s1508_s7 }
 0x350   :  { %p1257_p13 = pnand %p1255_p12, %p1252_p11 }
 0x352   :  { %1260 = shalt.err (!%p1257_p13)
}
 0x353   :  { %835 = dma.vmem_to_hbm [thread:$0]  %s833_s28, 256, %s1508_s7, [#allocation4]  }
 0x354   :  { %1269 = dma.done.wait [#allocation4], 256  }
 0x355   :  { %1270 = vsyncadd [#allocation4], 4294967040 }
 0x356   :  { %839 = vsyncpa [#allocation3], 1 }
 0x357   :  { %840 = vsyncpa [#allocation6], 1 }
 0x358   :  { %841 = vsyncpa [#allocation9], 1 }
 0x359   :  { %842 = vsyncpa [#allocation12], 1 }
 0x35a   :  { %843 = vsyncpa [#allocation4], 1 }

// kernel: tpu_custom_call.1
= control target key start
LH: loop header
LB: loop body
LE: loop exit
PB: predicated region body
PF: predicated region fallthrough
CT: control target
= control target key end

     0   :  { %12 = vsyncpa [#allocation3], 0  ;;  %s1501_s0 = inlined_call_operand.hbm [shape: f32[8,32], index: 0, kind: input, shape index: {}]   ;;  %s1502_s1 = inlined_call_operand.hbm [shape: f32[8,128], index: 1, kind: input, shape index: {}]   ;;  %s1503_s2 = inlined_call_operand.hbm [shape: bf16[32,128], index: 2, kind: input, shape index: {}]   ;;  %s1504_s3 = inlined_call_operand.hbm [shape: bf16[128,384], index: 3, kind: input, shape index: {}]   ;;  %s1505_s4 = inlined_call_operand.hbm [shape: bf16[128,384], index: 4, kind: input, shape index: {}]   ;;  %s1506_s5 = inlined_call_operand.hbm [shape: bf16[128,128], index: 5, kind: input, shape index: {}]   ;;  %s1507_s6 = inlined_call_operand.vmem [shape: f32[4,384], index: 6, kind: input, shape index: {}]   ;;  %s1508_s7 = inlined_call_operand.hbm [shape: f32[8,256], index: 7, kind: output, shape index: {}]  }
   0x1   :  { %13 = vsyncpa [#allocation6], 0 }
   0x2   :  { %14 = vsyncpa [#allocation9], 0 }
   0x3   :  { %15 = vsyncpa [#allocation12], 0 }
   0x4   :  { %16 = vsyncpa [#allocation4], 0  ;;  %s1271_s24 = smov [#allocation5]   ;;  %s1272_s26 = smov [#allocation8]  }
   0x5   :  { %s33_s25 = sshll.u32 %s1271_s24, 4  ;;  %s54_s27 = sshll.u32 %s1272_s26, 4  ;;  %s34_s25 = int_to_ptr.vmem [resolvable:$true] %s33_s25  ;;  %s1325_s27 = int_to_ptr.vmem [resolvable:$true] %s54_s27 }
   0x6   :  { %s1107_s30 = scalar_lea.hbm %s1502_s1, 128 }
   0x7   :  { %p1108_p0 = scmp.ne.s32.totalorder %s1502_s1, %s1107_s30  ;;  %p1111_p1 = scmp.lt.u32.totalorder %s1107_s30, %s1502_s1 }
   0x9   :  { %p1113_p2 = pnand %p1111_p1, %p1108_p0 }
   0xb   :  { %1116 = shalt.err (!%p1113_p2)
}
   0xc   :  { %s1117_s12 = scalar_lea.vmem %s34_s25, 128  ;;  %p1122_p4 = scmp.lt.s32.totalorder %s34_s25, %s34_s25 }
   0xd   :  { %p1118_p3 = scmp.ne.s32.totalorder %s34_s25, %s1117_s12  ;;  %p1123_p5 = scmp.lt.s32.totalorder %s1117_s12, %s1117_s12 }
   0xf   :  { %p1124_p6 = por %p1123_p5, %p1122_p4 }
  0x11   :  { %p1125_p7 = pnand %p1124_p6, %p1118_p3 }
  0x13   :  { %1128 = shalt.err (!%p1125_p7)
}
  0x14   :  { %36 = dma.hbm_to_vmem [thread:$0]  %s1502_s1, 128, %s34_s25, [#allocation6]  }
  0x15   :  { %s1129_s17 = scalar_lea.hbm %s1504_s3, 3072 }
  0x16   :  { %p1130_p8 = scmp.ne.s32.totalorder %s1504_s3, %s1129_s17  ;;  %p1133_p9 = scmp.lt.u32.totalorder %s1129_s17, %s1504_s3 }
  0x18   :  { %p1135_p10 = pnand %p1133_p9, %p1130_p8 }
  0x1a   :  { %1138 = shalt.err (!%p1135_p10)
}
  0x1b   :  { %s1139_s22 = scalar_lea.vmem %s1325_s27, 3072  ;;  %p1144_p12 = scmp.lt.s32.totalorder %s1325_s27, %s1325_s27 }
  0x1c   :  { %p1140_p11 = scmp.ne.s32.totalorder %s1325_s27, %s1139_s22  ;;  %p1145_p13 = scmp.lt.s32.totalorder %s1139_s22, %s1139_s22 }
  0x1e   :  { %p1146_p0 = por %p1145_p13, %p1144_p12 }
  0x20   :  { %p1147_p1 = pnand %p1146_p0, %p1140_p11 }
  0x22   :  { %1150 = shalt.err (!%p1147_p1)
}
  0x23   :  { %s1273_s1 = smov 192   ;;  %s1274_s23 = smov 12  }
  0x24   :  { %60 = dma.hbm_to_vmem [thread:$0]  %s1504_s3, 3072, %s1325_s27, [#allocation9], %s1273_s1, %s1273_s1, %s1274_s23  }
  0x25   :  { %s1275_s26 = smov [#allocation2]   ;;  %s1276_s29 = smov [#allocation7]  }
  0x26   :  { %s23_s28 = sshll.u32 %s1275_s26, 4  ;;  %s42_s30 = sshll.u32 %s1276_s29, 4  ;;  %s24_s28 = int_to_ptr.vmem [resolvable:$true] %s23_s28  ;;  %s1359_s30 = int_to_ptr.vmem [resolvable:$true] %s42_s30 }
  0x27   :  { %s1151_s10 = scalar_lea.hbm %s1501_s0, 128 }
  0x28   :  { %p1152_p2 = scmp.ne.s32.totalorder %s1501_s0, %s1151_s10  ;;  %p1155_p3 = scmp.lt.u32.totalorder %s1151_s10, %s1501_s0 }
  0x2a   :  { %p1157_p4 = pnand %p1155_p3, %p1152_p2 }
  0x2c   :  { %1160 = shalt.err (!%p1157_p4)
}
  0x2d   :  { %s1161_s3 = scalar_lea.vmem %s24_s28, 128  ;;  %p1166_p6 = scmp.lt.s32.totalorder %s24_s28, %s24_s28 }
  0x2e   :  { %p1162_p5 = scmp.ne.s32.totalorder %s24_s28, %s1161_s3  ;;  %p1167_p7 = scmp.lt.s32.totalorder %s1161_s3, %s1161_s3 }
  0x30   :  { %p1168_p8 = por %p1167_p7, %p1166_p6 }
  0x32   :  { %p1169_p9 = pnand %p1168_p8, %p1162_p5 }
  0x34   :  { %1172 = shalt.err (!%p1169_p9)
}
  0x35   :  { %26 = dma.hbm_to_vmem [thread:$0]  %s1501_s0, 128, %s24_s28, [#allocation3]  }
  0x36   :  { %s1173_s18 = scalar_lea.hbm %s1503_s2, 256 }
  0x37   :  { %p1174_p10 = scmp.ne.s32.totalorder %s1503_s2, %s1173_s18  ;;  %p1177_p11 = scmp.lt.u32.totalorder %s1173_s18, %s1503_s2 }
  0x39   :  { %p1179_p12 = pnand %p1177_p11, %p1174_p10 }
  0x3b   :  { %1182 = shalt.err (!%p1179_p12)
}
  0x3c   :  { %s1183_s24 = scalar_lea.vmem %s1359_s30, 256  ;;  %p1188_p0 = scmp.lt.s32.totalorder %s1359_s30, %s1359_s30 }
  0x3d   :  { %p1184_p13 = scmp.ne.s32.totalorder %s1359_s30, %s1183_s24  ;;  %p1189_p1 = scmp.lt.s32.totalorder %s1183_s24, %s1183_s24 }
  0x3f   :  { %p1190_p2 = por %p1189_p1, %p1188_p0 }
  0x41   :  { %p1191_p3 = pnand %p1190_p2, %p1184_p13 }
  0x43   :  { %1194 = shalt.err (!%p1191_p3)
}
  0x44   :  { %s1277_s0 = smov 64   ;;  %s1278_s25 = smov 4  }
  0x45   :  { %48 = dma.hbm_to_vmem [thread:$0]  %s1503_s2, 256, %s1359_s30, [#allocation6], %s1277_s0, %s1277_s0, %s1278_s25  }
  0x46   :  { %s1279_s29 = smov [#allocation10]   ;;  %s1280_s9 = smov [#allocation11]  }
  0x47   :  { %s66_s8 = sshll.u32 %s1279_s29, 4  ;;  %s78_s10 = sshll.u32 %s1280_s9, 4  ;;  %s67_s8 = int_to_ptr.vmem [resolvable:$true] %s66_s8  ;;  %s1393_s10 = int_to_ptr.vmem [resolvable:$true] %s78_s10 }
  0x48   :  { %s1195_s13 = scalar_lea.hbm %s1505_s4, 3072 }
  0x49   :  { %p1196_p4 = scmp.ne.s32.totalorder %s1505_s4, %s1195_s13  ;;  %p1199_p5 = scmp.lt.u32.totalorder %s1195_s13, %s1505_s4 }
  0x4b   :  { %p1201_p6 = pnand %p1199_p5, %p1196_p4 }
  0x4d   :  { %1204 = shalt.err (!%p1201_p6)
}
  0x4e   :  { %s1205_s2 = scalar_lea.vmem %s67_s8, 3072  ;;  %p1210_p8 = scmp.lt.s32.totalorder %s67_s8, %s67_s8 }
  0x4f   :  { %p1206_p7 = scmp.ne.s32.totalorder %s67_s8, %s1205_s2  ;;  %p1211_p9 = scmp.lt.s32.totalorder %s1205_s2, %s1205_s2 }
  0x51   :  { %p1212_p10 = por %p1211_p9, %p1210_p8 }
  0x53   :  { %p1213_p11 = pnand %p1212_p10, %p1206_p7 }
  0x55   :  { %1216 = shalt.err (!%p1213_p11)
}
  0x56   :  { %72 = dma.hbm_to_vmem [thread:$0]  %s1505_s4, 3072, %s67_s8, [#allocation9], %s1273_s1, %s1273_s1, %s1274_s23  }
  0x57   :  { %s1217_s19 = scalar_lea.hbm %s1506_s5, 1024 }
  0x58   :  { %p1218_p12 = scmp.ne.s32.totalorder %s1506_s5, %s1217_s19  ;;  %p1221_p13 = scmp.lt.u32.totalorder %s1217_s19, %s1506_s5 }
  0x5a   :  { %p1223_p0 = pnand %p1221_p13, %p1218_p12 }
  0x5c   :  { %1226 = shalt.err (!%p1223_p0)
}
  0x5d   :  { %s1227_s26 = scalar_lea.vmem %s1393_s10, 1024  ;;  %p1232_p2 = scmp.lt.s32.totalorder %s1393_s10, %s1393_s10 }
  0x5e   :  { %p1228_p1 = scmp.ne.s32.totalorder %s1393_s10, %s1227_s26  ;;  %p1233_p3 = scmp.lt.s32.totalorder %s1227_s26, %s1227_s26 }
  0x60   :  { %p1234_p4 = por %p1233_p3, %p1232_p2 }
  0x62   :  { %p1235_p5 = pnand %p1234_p4, %p1228_p1 }
  0x64   :  { %1238 = shalt.err (!%p1235_p5)
}
  0x65   :  { %84 = dma.hbm_to_vmem [thread:$0]  %s1506_s5, 1024, %s1393_s10, [#allocation12], %s1277_s0, %s1277_s0, %s1278_s25  }
  0x66   :  { %1261 = dma.done.wait [#allocation3], 128  }
  0x67   :  { %1262 = vsyncadd [#allocation3], 4294967168 }
  0x68   :  { %1263 = dma.done.wait [#allocation6], 384  }
  0x69   :  { %1264 = vsyncadd [#allocation6], 4294966912 }
  0x6a   :  { %1265 = dma.done.wait [#allocation9], 6144  }
  0x6b   :  { %1266 = vsyncadd [#allocation9], 4294961152 }
  0x6c   :  { %1267 = dma.done.wait [#allocation12], 1024  }
  0x6d   :  { %1268 = vsyncadd [#allocation12], 4294966272  ;;  %v1281_v0 = vmov 0.0   ;;  %vm1282_vm0 = vmmov 0   ;;  %v1023_v1 = vld [vmem:[#allocation7] sm:$0xff]   ;;  %v1024_v2 = vld [vmem:[#allocation7 + $0x8] sm:$0xff]   ;;  %v115_v31 = vlaneseq }
  0x6e   :  { %935 = vmatprep.subr.bf16.mxu0 %v1281_v0  ;;  %939 = vmatprep.mubr.msk.bf16.mxu0 %vm1282_vm0, %v1281_v0  ;;  %v108_v3 = vld [vmem:[#allocation2] sm:$0xff]  ;;  %vm131_vm1 = vcmask 261120   ;;  %v1028_v7 = vld [vmem:[#allocation8 + $0x8] ss:$12 sps:$4 sm:$0xff]   ;;  %v1035_v12 = vld [vmem:[#allocation8 + $0x30] ss:$12 sps:$4 sm:$0xff]  }
  0x6f   :  { %936 = vmatpush3.bf16.msra.mxu0 %v1023_v1  ;;  %v1025_v4 = vld [vmem:[#allocation8 + $0x4] ss:$12 sps:$4 sm:$0xff]   ;;  %v1027_v5 = vld [vmem:[#allocation8] ss:$12 sps:$4 sm:$0xff]   ;;  %v110_v6 = vpack.c.bf16 %v108_v3, %v108_v3  ;;  %v1029_v8 = vld [vmem:[#allocation8 + $0x1c] ss:$12 sps:$4 sm:$0xff]  }
  0x70   :  { %937 = vmatprep.subr.bf16.mxu0 %v1281_v0  ;;  %366 = vmatprep.subr.bf16.mxu1 %v1025_v4  ;;  %v1031_v9 = vld [vmem:[#allocation8 + $0x18] ss:$12 sps:$4 sm:$0xff]   ;;  %v1033_v10 = vld [vmem:[#allocation8 + $0x34] ss:$12 sps:$4 sm:$0xff]   ;;  %v1040_v17 = vld [vmem:[#allocation8 + $0x50] ss:$12 sps:$4 sm:$0xff]  }
  0x71   :  { %367 = vmatpush1.bf16.msra.mxu1 %v1027_v5  ;;  %v1032_v11 = vld [vmem:[#allocation8 + $0x20] ss:$12 sps:$4 sm:$0xff]   ;;  %v1036_v14 = vld [vmem:[#allocation8 + $0x38] ss:$12 sps:$4 sm:$0xff]   ;;  %v1039_v15 = vld [vmem:[#allocation8 + $0x48] ss:$12 sps:$4 sm:$0xff]  }
  0x72   :  { %368 = vmatprep.subr.bf16.mxu1 %v1029_v8  ;;  %v1037_v13 = vld [vmem:[#allocation8 + $0x4c] ss:$12 sps:$4 sm:$0xff]   ;;  %v1041_v16 = vld [vmem:[#allocation8 + $0x64] ss:$12 sps:$4 sm:$0xff]   ;;  %v1045_v19 = vld [vmem:[#allocation8 + $0x7c] ss:$12 sps:$4 sm:$0xff]  }
  0x73   :  { %938 = vmatpush3.bf16.msra.mxu0 %v1024_v2  ;;  %v1043_v18 = vld [vmem:[#allocation8 + $0x60] ss:$12 sps:$4 sm:$0xff]   ;;  %v1044_v20 = vld [vmem:[#allocation8 + $0x68] ss:$12 sps:$4 sm:$0xff]   ;;  %v1047_v21 = vld [vmem:[#allocation8 + $0x78] ss:$12 sps:$4 sm:$0xff]  }
  0x74   :  { %943 = vmatprep.subr.bf16.mxu0 %v1281_v0  ;;  %v1049_v22 = vld [vmem:[#allocation8 + $0x94] ss:$12 sps:$4 sm:$0xff]   ;;  %v1051_v24 = vld [vmem:[#allocation8 + $0x90] ss:$12 sps:$4 sm:$0xff]   ;;  %v1052_v25 = vld [vmem:[#allocation8 + $0x98] ss:$12 sps:$4 sm:$0xff]  }
  0x75   :  { %369 = vmatpush1.bf16.msra.mxu1 %v1031_v9  ;;  %v1048_v23 = vld [vmem:[#allocation8 + $0x80] ss:$12 sps:$4 sm:$0xff]   ;;  %v1055_v27 = vld [vmem:[#allocation8 + $0xa8] ss:$12 sps:$4 sm:$0xff]   ;;  %v1056_v28 = vld [vmem:[#allocation8 + $0xb0] ss:$12 sps:$4 sm:$0xff]  }
  0x76   :  { %940 = vmatmul.mubr.msk.bf16.vlgmr.msra.gmra.mrb[0].mxu0 %vm131_vm1, %v110_v6  ;;  %370 = vmatprep.subr.bf16.mxu1 %v1033_v10  ;;  %v1053_v26 = vld [vmem:[#allocation8 + $0xac] ss:$12 sps:$4 sm:$0xff]   ;;  %v1059_v29 = vld [vmem:[#allocation10 + $0x4] ss:$12 sps:$4 sm:$0xff]   ;;  %v1283_v30 = vmov 0   ;;  %v1445_v32 = vshrl.u32 %v115_v31, 7 }
  0x77   :  { %944 = vmatpush3.bf16.msra.mxu0 %v1028_v7  ;;  %959 = vmatprep.mubr.msk.bf16.mxu0 %vm1282_vm0, %v1281_v0  ;;  %v1451_v34 = vld [vmem:[%s1507_s6] sm:$0xff]  ;;  %v1057_v42 = vld [vmem:[#allocation10] ss:$12 sps:$4 sm:$0xff]   ;;  %v1062_v45 = vld [vmem:[#allocation10 + $0x1c] ss:$12 sps:$4 sm:$0xff]  }
  0x78   :  { %945 = vmatprep.subr.bf16.mxu0 %v1281_v0  ;;  %398 = vmatprep.mubr.bf16.mxu1 %v1283_v30  ;;  %v117_v33 = vsub.s32 0, %v1445_v32  ;;  %v1078_v43 = vld [vmem:[#allocation10 + $0x8] ss:$12 sps:$4 sm:$0xff]   ;;  %v1060_v46 = vld [vmem:[#allocation10 + $0x18] ss:$12 sps:$4 sm:$0xff]  }
  0x79   :  { %371 = vmatpush1.bf16.msra.mxu1 %v1035_v12  ;;  %v1082_v47 = vld [vmem:[#allocation10 + $0x20] ss:$12 sps:$4 sm:$0xff]   ;;  %v1063_v49 = vld [vmem:[#allocation10 + $0x30] ss:$12 sps:$4 sm:$0xff]   ;;  %v1083_v50 = vld [vmem:[#allocation10 + $0x38] ss:$12 sps:$4 sm:$0xff]  }
  0x7a   :  { %372 = vmatprep.subr.bf16.mxu1 %v1037_v13  ;;  %v118_v35 = vrot.slane %v1451_v34, %v117_v33  ;;  %v1065_v48 = vld [vmem:[#allocation10 + $0x34] ss:$12 sps:$4 sm:$0xff]   ;;  %v1068_v51 = vld [vmem:[#allocation10 + $0x4c] ss:$12 sps:$4 sm:$0xff]   ;;  %v1084_v53 = vld [vmem:[#allocation10 + $0x50] ss:$12 sps:$4 sm:$0xff]  }
  0x7b   :  { %946 = vmatpush3.bf16.msra.mxu0 %v1032_v11  ;;  %v1066_v52 = vld [vmem:[#allocation10 + $0x48] ss:$12 sps:$4 sm:$0xff]   ;;  %v1071_v54 = vld [vmem:[#allocation10 + $0x64] ss:$12 sps:$4 sm:$0xff]   ;;  %v1069_v55 = vld [vmem:[#allocation10 + $0x60] ss:$12 sps:$4 sm:$0xff]  }
  0x7c   :  { %947 = vmatprep.subr.bf16.mxu0 %v1281_v0  ;;  %v1085_v56 = vld [vmem:[#allocation10 + $0x68] ss:$12 sps:$4 sm:$0xff]   ;;  %v1072_v58 = vld [vmem:[#allocation10 + $0x78] ss:$12 sps:$4 sm:$0xff]   ;;  %v1086_v59 = vld [vmem:[#allocation10 + $0x80] ss:$12 sps:$4 sm:$0xff]  }
  0x7d   :  { %373 = vmatpush1.bf16.msra.mxu1 %v1039_v15  ;;  %v1074_v57 = vld [vmem:[#allocation10 + $0x7c] ss:$12 sps:$4 sm:$0xff]   ;;  %v1077_v60 = vld [vmem:[#allocation10 + $0x94] ss:$12 sps:$4 sm:$0xff]   ;;  %v1087_v62 = vld [vmem:[#allocation10 + $0x98] ss:$12 sps:$4 sm:$0xff]  }
  0x7e   :  { %374 = vmatprep.subr.bf16.mxu1 %v1041_v16  ;;  %v1075_v61 = vld [vmem:[#allocation10 + $0x90] ss:$12 sps:$4 sm:$0xff]   ;;  %v1081_v63 = vld [vmem:[#allocation10 + $0xac] ss:$12 sps:$4 sm:$0xff]   ;;  %v1079_v1 = vld [vmem:[#allocation10 + $0xa8] ss:$12 sps:$4 sm:$0xff]  }
  0x7f   :  { %948 = vmatpush3.bf16.msra.mxu0 %v1036_v14  ;;  %v1462_v2 = vld [vmem:[#allocation5] sm:$0xff]  ;;  %v1088_v3 = vld [vmem:[#allocation10 + $0xb0] ss:$12 sps:$4 sm:$0xff]   ;;  %v1089_v5 = vld [vmem:[#allocation11] sm:$0xff]  }
  0x80   :  { %949 = vmatprep.subr.bf16.mxu0 %v1281_v0  ;;  %v447_v4 = vpack.c.bf16 %v1462_v2, %v1462_v2  ;;  %v1090_v6 = vld [vmem:[#allocation11 + $0x8] sm:$0xff]   ;;  %v1091_v7 = vld [vmem:[#allocation11 + $0x10] sm:$0xff]   ;;  %v1092_v8 = vld [vmem:[#allocation11 + $0x18] sm:$0xff]  }
  0x81   :  { %375 = vmatpush1.bf16.msra.mxu1 %v1043_v18  ;;  %v1093_v9 = vld [vmem:[#allocation11 + $0x20] sm:$0xff]   ;;  %v1094_v10 = vld [vmem:[#allocation11 + $0x28] sm:$0xff]   ;;  %v1095_v11 = vld [vmem:[#allocation11 + $0x30] sm:$0xff]   ;;  %v217_v18 = vsub.s32 5, %v1445_v32 }
  0x82   :  { %376 = vmatprep.subr.bf16.mxu1 %v1045_v19  ;;  %v1096_v12 = vld [vmem:[#allocation11 + $0x38] sm:$0xff]  }
  0x83   :  { %950 = vmatpush3.bf16.msra.mxu0 %v1040_v17  ;;  %v213_v17 = vsub.s32 1, %v1445_v32 }
  0x84   :  { %951 = vmatprep.subr.bf16.mxu0 %v1281_v0 }
  0x85   :  { %377 = vmatpush1.bf16.msra.mxu1 %v1047_v21  ;;  %v214_v19 = vrot.slane %v1451_v34, %v213_v17 }
  0x86   :  { %378 = vmatprep.subr.bf16.mxu1 %v1049_v22 }
  0x87   :  { %952 = vmatpush3.bf16.msra.mxu0 %v1044_v20  ;;  %v218_v20 = vrot.slane %v1451_v34, %v217_v18  ;;  %v229_v21 = vrot.slane %v214_v19, %v213_v17 }
  0x88   :  { %953 = vmatprep.subr.bf16.mxu0 %v1281_v0 }
  0x89   :  { %379 = vmatpush1.bf16.msra.mxu1 %v1051_v24 }
  0x8a   :  { %380 = vmatprep.subr.bf16.mxu1 %v1053_v26 }
  0x8b   :  { %954 = vmatpush3.bf16.msra.mxu0 %v1048_v23  ;;  %v233_v23 = vrot.slane %v218_v20, %v213_v17 }
  0x8c   :  { %955 = vmatprep.subr.bf16.mxu0 %v1281_v0 }
  0x8d   :  { %381 = vmatpush1.bf16.msra.mxu1 %v1055_v27 }
  0x8e   :  { %608 = vmatprep.subr.bf16.mxu1 %v1059_v29 }
  0x8f   :  { %956 = vmatpush3.bf16.msra.mxu0 %v1052_v25 }
  0x90   :  { %957 = vmatprep.subr.bf16.mxu0 %v1281_v0 }
  0x93   :  { %958 = vmatpush3.bf16.msra.mxu0 %v1056_v28 }
  0x94   :  { %963 = vmatprep.subr.bf16.mxu0 %v1281_v0 }
 0x149   :  { %v169_v36 = vpop.f32.mrb[0].mxu0 }
 0x14a   :  { %v170_v37 = vadd.f32 %v169_v36, %v118_v35  ;;  %v941_v38 = vpop.f32.mrb[1].mxu0 }
 0x14b   :  { %v172_v39 = vpop.f32.mrb[2].mxu0  ;;  %v705_v38 = vsub.s32 2, %v1445_v32 }
 0x14c   :  { %v175_v40 = vmax.f32 %v170_v37, 0.0  ;;  %v942_v41 = vpop.f32.mrb[3].mxu0  ;;  %v107_v39 = vld [vmem:[%s1507_s6 + $0x8] sm:$0xf]  ;;  %s1284_s6 = smov [#allocation13]  }
 0x14d   :  { %v706_v41 = vrot.slane %v1451_v34, %v705_v38  ;;  %s832_s28 = sshll.u32 %s1284_s6, 4  ;;  %s833_s28 = int_to_ptr.vmem [resolvable:$true] %s832_s28 }
 0x14e   :  { %v176_v44 = vpack.c.bf16 %v175_v40, %v175_v40  ;;  %v222_v40 = vrot.slane %v107_v39, %v213_v17  ;;  %s1239_s29 = scalar_lea.vmem %s833_s28, 256  ;;  %p1244_p7 = scmp.lt.s32.totalorder %s833_s28, %s833_s28 }
 0x14f   :  { %p1240_p6 = scmp.ne.s32.totalorder %s833_s28, %s1239_s29  ;;  %p1245_p8 = scmp.lt.s32.totalorder %s1239_s29, %s1239_s29 }
 0x150   :  { %399 = vmatmul.mubr.bf16.vlgmr.msra.gmra.mrb[0].mxu1 %v176_v44  ;;  %960 = vmatmul.mubr.bf16.vlgmr.msra.gmra.mrb[4].mxu0 %v176_v44 }
 0x151   :  { %609 = vmatpush1.bf16.msra.mxu1 %v1057_v42  ;;  %964 = vmatpush3.bf16.msra.mxu0 %v1078_v43  ;;  %v237_v43 = vrot.slane %v222_v40, %v213_v17  ;;  %p1246_p9 = por %p1245_p8, %p1244_p7 }
 0x152   :  { %610 = vmatprep.subr.bf16.mxu1 %v1062_v45  ;;  %965 = vmatprep.subr.bf16.mxu0 %v1281_v0 }
 0x153   :  { %640 = vmatprep.mubr.bf16.mxu1 %v1283_v30  ;;  %979 = vmatprep.mubr.msk.bf16.mxu0 %vm1282_vm0, %v1281_v0  ;;  %p1247_p10 = pnand %p1246_p9, %p1240_p6 }
 0x155   :  { %611 = vmatpush1.bf16.msra.mxu1 %v1060_v46  ;;  %966 = vmatpush3.bf16.msra.mxu0 %v1082_v47 }
 0x156   :  { %612 = vmatprep.subr.bf16.mxu1 %v1065_v48  ;;  %967 = vmatprep.subr.bf16.mxu0 %v1281_v0 }
 0x159   :  { %613 = vmatpush1.bf16.msra.mxu1 %v1063_v49  ;;  %968 = vmatpush3.bf16.msra.mxu0 %v1083_v50 }
 0x15a   :  { %614 = vmatprep.subr.bf16.mxu1 %v1068_v51  ;;  %969 = vmatprep.subr.bf16.mxu0 %v1281_v0 }
 0x15d   :  { %615 = vmatpush1.bf16.msra.mxu1 %v1066_v52  ;;  %970 = vmatpush3.bf16.msra.mxu0 %v1084_v53 }
 0x15e   :  { %616 = vmatprep.subr.bf16.mxu1 %v1071_v54  ;;  %971 = vmatprep.subr.bf16.mxu0 %v1281_v0 }
 0x161   :  { %617 = vmatpush1.bf16.msra.mxu1 %v1069_v55  ;;  %972 = vmatpush3.bf16.msra.mxu0 %v1085_v56 }
 0x162   :  { %618 = vmatprep.subr.bf16.mxu1 %v1074_v57  ;;  %973 = vmatprep.subr.bf16.mxu0 %v1281_v0  ;;  %v734_v57 = vsub.s32 3, %v1445_v32 }
 0x165   :  { %619 = vmatpush1.bf16.msra.mxu1 %v1072_v58  ;;  %974 = vmatpush3.bf16.msra.mxu0 %v1086_v59  ;;  %v735_v58 = vrot.slane %v1451_v34, %v734_v57 }
 0x166   :  { %620 = vmatprep.subr.bf16.mxu1 %v1077_v60  ;;  %975 = vmatprep.subr.bf16.mxu0 %v1281_v0 }
 0x169   :  { %621 = vmatpush1.bf16.msra.mxu1 %v1075_v61  ;;  %976 = vmatpush3.bf16.msra.mxu0 %v1087_v62 }
 0x16a   :  { %622 = vmatprep.subr.bf16.mxu1 %v1081_v63  ;;  %977 = vmatprep.subr.bf16.mxu0 %v1281_v0 }
 0x16d   :  { %623 = vmatpush1.bf16.msra.mxu1 %v1079_v1  ;;  %978 = vmatpush3.bf16.msra.mxu0 %v1088_v3 }
 0x16e   :  { %983 = vmatprep.subr.bf16.mxu1 %v1281_v0 }
 0x170   :  { %641 = vmatmul.mubr.bf16.vlgmr.msra.gmra.mrb[0].mxu1 %v447_v4  ;;  %980 = vmatmul.mubr.bf16.vlgmr.msra.gmra.mrb[8].mxu0 %v447_v4 }
 0x171   :  { %999 = vmatprep.mubr.msk.bf16.mxu1 %vm1282_vm0, %v1281_v0  ;;  %984 = vmatpush3.bf16.msra.mxu1 %v1089_v5 }
 0x172   :  { %985 = vmatprep.subr.bf16.mxu1 %v1281_v0 }
 0x175   :  { %986 = vmatpush3.bf16.msra.mxu1 %v1090_v6 }
 0x176   :  { %987 = vmatprep.subr.bf16.mxu1 %v1281_v0 }
 0x179   :  { %988 = vmatpush3.bf16.msra.mxu1 %v1091_v7 }
 0x17a   :  { %989 = vmatprep.subr.bf16.mxu1 %v1281_v0 }
 0x17d   :  { %990 = vmatpush3.bf16.msra.mxu1 %v1092_v8 }
 0x17e   :  { %991 = vmatprep.subr.bf16.mxu1 %v1281_v0 }
 0x181   :  { %992 = vmatpush3.bf16.msra.mxu1 %v1093_v9 }
 0x182   :  { %993 = vmatprep.subr.bf16.mxu1 %v1281_v0 }
 0x185   :  { %994 = vmatpush3.bf16.msra.mxu1 %v1094_v10 }
 0x186   :  { %995 = vmatprep.subr.bf16.mxu1 %v1281_v0 }
 0x189   :  { %996 = vmatpush3.bf16.msra.mxu1 %v1095_v11 }
 0x18a   :  { %997 = vmatprep.subr.bf16.mxu1 %v1281_v0 }
 0x18d   :  { %998 = vmatpush3.bf16.msra.mxu1 %v1096_v12 }
 0x223   :  { %v441_v13 = vpop.f32.mrb[4].mxu0 }
 0x224   :  { %v961_v14 = vpop.f32.mrb[5].mxu0  ;;  %v442_v47 = vadd.f32 %v441_v13, %v237_v43 }
 0x225   :  { %v444_v15 = vpop.f32.mrb[6].mxu0 }
 0x226   :  { %v962_v16 = vpop.f32.mrb[7].mxu0 }
 0x243   :  { %v642_v22 = vpop.f32.mrb[0].mxu1  ;;  %v683_v24 = vpop.f32.mrb[8].mxu0 }
 0x244   :  { %v1003_v25 = vadd.f32 %v642_v22, %v229_v21  ;;  %v644_v26 = vpop.f32.mrb[1].mxu1  ;;  %v981_v0 = vpop.f32.mrb[9].mxu0  ;;  %v707_v45 = vadd.f32 %v706_v41, %v683_v24 }
 0x245   :  { %v646_v27 = vpop.f32.mrb[2].mxu1  ;;  %v686_v28 = vpop.f32.mrb[10].mxu0  ;;  %v1004_v33 = vadd.f32 %v644_v26, %v233_v23 }
 0x246   :  { %v895_v29 = vmul.f32 -1.442695, %v1003_v25  ;;  %v647_v30 = vpop.f32.mrb[3].mxu1  ;;  %v982_v31 = vpop.f32.mrb[11].mxu0 }
 0x247   :  { %v896_v35 = vmul.f32 -1.442695, %v1004_v33 }
 0x248   :  { %1097 = vpow2.f32 %v895_v29 }
 0x249   :  { %1099 = vpow2.f32 %v896_v35 }
 0x252   :  { %v1098_v36 = vpop.eup %1097 }
 0x253   :  { %v697_v37 = vadd.f32 1.0, %v1098_v36  ;;  %v1100_v42 = vpop.eup %1099 }
 0x254   :  { %v698_v44 = vadd.f32 1.0, %v1100_v42 }
 0x255   :  { %1101 = vrcp.f32 %v697_v37 }
 0x256   :  { %1103 = vrcp.f32 %v698_v44 }
 0x25f   :  { %v1102_v46 = vpop.eup %1101 }
 0x260   :  { %v708_v48 = vmul.f32 %v1102_v46, %v707_v45  ;;  %v1104_v50 = vpop.eup %1103 }
 0x261   :  { %v711_v51 = vsub.f32 1.0, %v1104_v50  ;;  %v713_v54 = vmul.f32 %v1104_v50, %v1462_v2 }
 0x262   :  { %v709_v49 = vadd.f32 %v708_v48, %v442_v47 }
 0x264   :  { %1105 = vtanh.f32 %v709_v49 }
 0x26e   :  { %v1106_v52 = vpop.eup %1105 }
 0x26f   :  { %v712_v53 = vmul.f32 %v1106_v52, %v711_v51 }
 0x271   :  { %v714_v55 = vadd.f32 %v713_v54, %v712_v53 }
 0x273   :  { %v715_v56 = vpack.c.bf16 %v714_v55, %v714_v55  ;;  %825 = vst [vmem:[#allocation13 + $0x8] sm:$0xff] %v714_v55 }
 0x275   :  { %1000 = vmatmul.mubr.bf16.vlgmr.msra.gmra.mrb[4].mxu1 %v715_v56 }
 0x348   :  { %v818_v59 = vpop.f32.mrb[4].mxu1 }
 0x349   :  { %v819_v60 = vadd.f32 %v818_v59, %v735_v58  ;;  %v1001_v61 = vpop.f32.mrb[5].mxu1 }
 0x34a   :  { %v821_v62 = vpop.f32.mrb[6].mxu1 }
 0x34b   :  { %824 = vst [vmem:[#allocation13] sm:$0xff] %v819_v60  ;;  %v1002_v63 = vpop.f32.mrb[7].mxu1 }
 0x34c   :  { %1250 = shalt.err (!%p1247_p10)
}
 0x34d   :  { %s1251_s10 = scalar_lea.hbm %s1508_s7, 256 }
 0x34e   :  { %p1252_p11 = scmp.ne.s32.totalorder %s1508_s7, %s1251_s10  ;;  %p1255_p12 = scmp.lt.u32.totalorder %s1251_s10, %s1508_s7 }
 0x350   :  { %p1257_p13 = pnand %p1255_p12, %p1252_p11 }
 0x352   :  { %1260 = shalt.err (!%p1257_p13)
}
 0x353   :  { %835 = dma.vmem_to_hbm [thread:$0]  %s833_s28, 256, %s1508_s7, [#allocation4]  }
 0x354   :  { %1269 = dma.done.wait [#allocation4], 256  }
 0x355   :  { %1270 = vsyncadd [#allocation4], 4294967040 }
 0x356   :  { %839 = vsyncpa [#allocation3], 1 }
 0x357   :  { %840 = vsyncpa [#allocation6], 1 }
 0x358   :  { %841 = vsyncpa [#allocation9], 1 }
 0x359   :  { %842 = vsyncpa [#allocation12], 1 }
 0x35a   :  { %843 = vsyncpa [#allocation4], 1 }

</bundles_post_ra>
